<compile_context>
chip_gen: v6e
topology: v6e:2x2x1
jax: 0.10.0
libtpu: 0.0.40
codegen_flags: <defaults>
</compile_context>

<pallas_src>
import jax
import jax.numpy as jnp
import numpy as np
from jax import lax
from jax.experimental import pallas as pl
from jax.experimental.pallas import tpu as pltpu

IMAGE_CHANNELS = 4
K1, S1 = 8, 4          # conv1 kernel / stride
K2, S2 = 4, 2          # conv2 kernel / stride
HEAD_PAD = 128         # lane-dense padded head width (lane0 = actor, lane1 = critic)


def _round_up(x, m):
    return ((x + m - 1) // m) * m


# ----------------------------- fused Pallas kernel --------------------------

def _make_kernel(C, n_strips, OH2, L1P):
    """Fused conv1+conv2+fc1+heads kernel for one batch block of B examples."""
    needed_rows = sorted({S2 * oh2 + kh for oh2 in range(OH2) for kh in range(K2)})

    def kernel(x_ref, v_ref, b1_ref, w2_ref, b2_ref,
               wf_ref, bf_ref, wh_ref, bh_ref, out_ref):
        B = out_ref.shape[0]
        S1W = x_ref.shape[-1]

        # ---- conv1: per-channel, full-height aligned MXU dots ----------------
        # x block: (B, C, n_strips, S1*W)  (reshape-only view of NCHW).
        # v_ref[c]: (S1*W, 2*L1P) — both row taps concatenated along columns.
        u = None
        for c in range(C):
            xc = x_ref[:, c:c + 1, :, :].reshape(B * n_strips, S1W)
            uc = jnp.dot(xc, v_ref[c], preferred_element_type=jnp.float32)
            u = uc if u is None else u + uc
        u3 = u.reshape(B, n_strips, 2 * L1P)
        b1 = b1_ref[...]                                    # (1, L1P)

        # conv1 output row r = tap0 @ strip r  +  tap1 @ strip r+1  (+ bias, ReLU).
        h0 = {}
        for r in needed_rows:
            t0 = u3[:, r:r + 1, :L1P].reshape(B, L1P)
            t1 = u3[:, r + 1:r + 2, L1P:].reshape(B, L1P)
            h0[r] = jnp.maximum(t0 + t1 + b1, 0.0)          # (B, L1P)  lanes=(ow1, c1)

        # ---- conv2 + ReLU: one (B, K2*L1P)@(K2*L1P, L2P) dot per output row ---
        w2 = w2_ref[...]                                    # (K2*L1P, L2P)
        b2 = b2_ref[...]                                    # (1, L2P)
        h1s = []
        for oh2 in range(OH2):
            rows = jnp.concatenate([h0[S2 * oh2 + kh] for kh in range(K2)], axis=1)
            h1s.append(jnp.maximum(
                jnp.dot(rows, w2, preferred_element_type=jnp.float32) + b2, 0.0))

        # ---- fc1 + ReLU: single (B, OH2*L2P)@(OH2*L2P, 256) dot ---------------
        h1 = jnp.concatenate(h1s, axis=1) if len(h1s) > 1 else h1s[0]
        h3 = jnp.maximum(
            jnp.dot(h1, wf_ref[...], preferred_element_type=jnp.float32)
            + bf_ref[...], 0.0)                             # (B, 256)

        # ---- merged actor/critic head, lane-padded for a dense store ---------
        head = jnp.dot(h3, wh_ref[...],
                       preferred_element_type=jnp.float32) + bh_ref[...]   # (B, 128)
        col = lax.broadcasted_iota(jnp.int32, head.shape, 1)
        sig = 1.0 / (1.0 + jnp.exp(-head))
        out_ref[...] = jnp.where(col == 0, sig, head)       # lane0: sigmoid(actor), lane1: critic

    return kernel


def _const_spec(a):
    """Full-array BlockSpec with a constant index map (weights / biases)."""
    nd = a.ndim
    return pl.BlockSpec(a.shape, lambda n: (0,) * nd)


# --------------------------- offline weight preparation ---------------------

def prepare_params(params, H, W):
    """Fold conv geometry, lane padding and the NCHW flatten permutation into
    dense MXU-friendly weights.  Runs once, offline (weights are constant)."""
    w1 = np.asarray(params['conv1_w'], np.float32)   # (OC1, C, K1, K1)
    b1 = np.asarray(params['conv1_b'], np.float32)
    w2 = np.asarray(params['conv2_w'], np.float32)   # (OC2, OC1, K2, K2)
    b2 = np.asarray(params['conv2_b'], np.float32)
    fw = np.asarray(params['fc1_w'], np.float32)     # (256, OC2*OH2*OW2)
    fb = np.asarray(params['fc1_b'], np.float32)
    aw = np.asarray(params['actor_w'], np.float32)   # (1, 256)
    ab = np.asarray(params['actor_b'], np.float32)
    cw = np.asarray(params['critic_w'], np.float32)
    cb = np.asarray(params['critic_b'], np.float32)

    OC1, C, k1, _ = w1.shape
    OC2, _, k2, _ = w2.shape
    assert k1 == K1 and k2 == K2 and K1 == 2 * S1
    assert H % S1 == 0 and W % S1 == 0
    OH1 = (H - K1) // S1 + 1
    OW1 = (W - K1) // S1 + 1
    OH2 = (OH1 - K2) // S2 + 1
    OW2 = (OW1 - K2) // S2 + 1
    assert OH2 >= 1 and OW2 >= 1 and fw.shape[1] == OC2 * OH2 * OW2
    nf = fw.shape[0]                                 # 256

    A1 = K1 // S1                                    # conv1 row taps (=2)
    S1W = S1 * W                                     # lanes of one (channel, strip) row
    L1 = OW1 * OC1
    L1P = _round_up(L1, 128)
    L2 = OW2 * OC2
    L2P = _round_up(L2, 128)

    # conv1: per-channel weights; both taps concatenated along the column dim.
    #   V[c, r*W + w_in, a*L1P + ow1*OC1 + oc1] = w1[oc1, c, S1*a + r, w_in - S1*ow1]
    V = np.zeros((C, S1W, A1 * L1P), np.float32)
    for c in range(C):
        for a in range(A1):
            for ow1 in range(OW1):
                for kw in range(K1):
                    w_in = S1 * ow1 + kw
                    for r in range(S1):
                        V[c, r * W + w_in,
                          a * L1P + ow1 * OC1: a * L1P + ow1 * OC1 + OC1] = \
                            w1[:, c, S1 * a + r, kw]
    b1row = np.zeros((1, L1P), np.float32)
    b1row[0, :L1] = np.tile(b1, OW1)

    # conv2: K2 row-taps stacked along the contraction dim, columns padded to L2P.
    W2s = np.zeros((K2 * L1P, L2P), np.float32)
    for kh in range(K2):
        for ow2 in range(OW2):
            for kw in range(K2):
                ow1 = S2 * ow2 + kw
                W2s[kh * L1P + ow1 * OC1: kh * L1P + ow1 * OC1 + OC1,
                    ow2 * OC2: ow2 * OC2 + OC2] = w2[:, :, kh, kw].T
    b2row = np.zeros((1, L2P), np.float32)
    b2row[0, :L2] = np.tile(b2, OW2)

    # fc1: fold the PyTorch (c2, oh2, ow2) flatten order; rows stacked by oh2.
    fwr = fw.reshape(nf, OC2, OH2, OW2)
    Wfs = np.zeros((OH2 * L2P, nf), np.float32)
    for oh2 in range(OH2):
        for ow2 in range(OW2):
            Wfs[oh2 * L2P + ow2 * OC2: oh2 * L2P + (ow2 + 1) * OC2, :] = \
                fwr[:, :, oh2, ow2].T
    bf = fb[None, :].astype(np.float32)

    # merged actor/critic head, lane-padded to HEAD_PAD for a dense store.
    Wh = np.zeros((nf, HEAD_PAD), np.float32)
    Wh[:, 0] = aw[0]
    Wh[:, 1] = cw[0]
    bh = np.zeros((1, HEAD_PAD), np.float32)
    bh[0, 0] = float(ab[0])
    bh[0, 1] = float(cb[0])

    prepped = dict(V=V, b1=b1row, W2=W2s, b2=b2row, Wf=Wfs, bf=bf, Wh=Wh, bh=bh)
    return {k: jnp.asarray(v) for k, v in prepped.items()}


# ------------------------------- forward wrapper ----------------------------

def actor_critic_forward(x, pp):
    N, C, H, W = x.shape
    n_strips = H // S1
    S1W = S1 * W
    OH1 = (H - K1) // S1 + 1
    OH2 = (OH1 - K2) // S2 + 1
    A1 = K1 // S1
    L1P = pp['V'].shape[2] // A1
    L2P = pp['b2'].shape[1]
    nf = pp['bf'].shape[1]

    # Batch block: at least 8 rows (sublane-aligned M), capped at 128 (fills the
    # v5e MXU height; bump to 256 on v6e/v7x if VMEM / spill headroom allows).
    B = 128 if N >= 128 else _round_up(max(N, 1), 8)
    Npad = _round_up(N, B)

    x = x.astype(jnp.float32)
    if Npad != N:
        x = jnp.pad(x, ((0, Npad - N), (0, 0), (0, 0), (0, 0)))
    # Pure reshape of NCHW (no transpose, no extra HBM pass): rows index
    # (channel, strip-of-S1-image-rows); lanes index (row-in-strip, width).
    xr = x.reshape(Npad, C, n_strips, S1W)

    kernel = _make_kernel(C, n_strips, OH2, L1P)
    weights = (pp['V'], pp['b1'], pp['W2'], pp['b2'],
               pp['Wf'], pp['bf'], pp['Wh'], pp['bh'])

    macs_per_ex = (C * n_strips * S1W * 2 * L1P        # conv1
                   + OH2 * K2 * L1P * L2P              # conv2
                   + OH2 * L2P * nf                    # fc1
                   + nf * HEAD_PAD)                    # heads
    cost = pl.CostEstimate(
        flops=2 * Npad * macs_per_ex,
        transcendentals=Npad * HEAD_PAD,
        bytes_accessed=4 * (xr.size + sum(w.size for w in weights) + Npad * HEAD_PAD))

    out = pl.pallas_call(
        kernel,
        grid=(Npad // B,),
        in_specs=[pl.BlockSpec((B, C, n_strips, S1W), lambda n: (n, 0, 0, 0))]
                 + [_const_spec(w) for w in weights],
        out_specs=pl.BlockSpec((B, HEAD_PAD), lambda n: (n, 0)),
        out_shape=jax.ShapeDtypeStruct((Npad, HEAD_PAD), jnp.float32),
        compiler_params=pltpu.CompilerParams(
            dimension_semantics=("parallel",)),
        cost_estimate=cost,
    )(xr, *weights)

    actor_out = out[:N, 0:1]
    critic_out = out[:N, 1:2]
    return actor_out, critic_out


# ------------------------------ reference & init ----------------------------

def ref_forward(x, params):
    """Pure-JAX reference (mirrors the PyTorch module)."""
    dn = ('NCHW', 'OIHW', 'NCHW')
    h0 = jax.nn.relu(
        lax.conv_general_dilated(x, params['conv1_w'], (4, 4), 'VALID',
                                 dimension_numbers=dn)
        + params['conv1_b'][None, :, None, None])
    h1 = jax.nn.relu(
        lax.conv_general_dilated(h0, params['conv2_w'], (2, 2), 'VALID',
                                 dimension_numbers=dn)
        + params['conv2_b'][None, :, None, None])
    h2 = h1.reshape(x.shape[0], -1)
    h3 = jax.nn.relu(h2 @ params['fc1_w'].T + params['fc1_b'])
    a1 = h3 @ params['actor_w'].T + params['actor_b']
    c1 = h3 @ params['critic_w'].T + params['critic_b']
    return jax.nn.sigmoid(a1), c1


def init_params(key, flat_features):
    """Deterministic PyTorch-style uniform(-1/sqrt(fan_in), 1/sqrt(fan_in)) init."""
    ks = jax.random.split(key, 10)

    def u(k, shape, fan_in):
        bound = 1.0 / float(fan_in) ** 0.5
        return jax.random.uniform(k, shape, jnp.float32, -bound, bound)

    return {
        'conv1_w': u(ks[0], (16, IMAGE_CHANNELS, 8, 8), IMAGE_CHANNELS * 8 * 8),
        'conv1_b': u(ks[1], (16,), IMAGE_CHANNELS * 8 * 8),
        'conv2_w': u(ks[2], (32, 16, 4, 4), 16 * 4 * 4),
        'conv2_b': u(ks[3], (32,), 16 * 4 * 4),
        'fc1_w':   u(ks[4], (256, flat_features), flat_features),
        'fc1_b':   u(ks[5], (256,), flat_features),
        'actor_w': u(ks[6], (1, 256), 256),
        'actor_b': u(ks[7], (1,), 256),
        'critic_w': u(ks[8], (1, 256), 256),
        'critic_b': u(ks[9], (1,), 256),
    }


if __name__ == "__main__":
    key = jax.random.PRNGKey(0)
    k_x, k_p = jax.random.split(key)

    # Smallest lane-aligned spatial size where both convolutions are non-empty.
    N, H, W = 2, 32, 32
    x = jax.random.uniform(k_x, (N, IMAGE_CHANNELS, H, W), jnp.float32)

    OH1, OW1 = (H - K1) // S1 + 1, (W - K1) // S1 + 1
    OH2, OW2 = (OH1 - K2) // S2 + 1, (OW1 - K2) // S2 + 1
    flat_features = 32 * OH2 * OW2            # what LazyLinear would infer

    params = init_params(k_p, flat_features)
    pp = prepare_params(params, H, W)         # one-time, outside the jitted forward

    fwd = jax.jit(actor_critic_forward)
    actor_out, critic_out = fwd(x, pp)
    jax.block_until_ready((actor_out, critic_out))

    ra, rc = ref_forward(x, params)
    assert actor_out.shape == (N, 1) and critic_out.shape == (N, 1)
    assert jnp.allclose(actor_out, ra, atol=1e-5, rtol=1e-5)
    assert jnp.allclose(critic_out, rc, atol=1e-4, rtol=1e-4)

    print("KERNEL_OK")
</pallas_src>

<mosaic_0001>
module attributes {stable_mosaic.version = 11 : i64} {
  func.func @kernel(%arg0: i32, %arg1: memref<8x4x8x128xf32, #tpu.memory_space<vmem>>, %arg2: memref<4x128x256xf32, #tpu.memory_space<vmem>>, %arg3: memref<1x128xf32, #tpu.memory_space<vmem>>, %arg4: memref<512x128xf32, #tpu.memory_space<vmem>>, %arg5: memref<1x128xf32, #tpu.memory_space<vmem>>, %arg6: memref<256x256xf32, #tpu.memory_space<vmem>>, %arg7: memref<1x256xf32, #tpu.memory_space<vmem>>, %arg8: memref<256x128xf32, #tpu.memory_space<vmem>>, %arg9: memref<1x128xf32, #tpu.memory_space<vmem>>, %arg10: memref<8x128xf32, #tpu.memory_space<vmem>>) attributes {dimension_semantics = [#tpu.dimension_semantics<parallel>], iteration_bounds = array<i64: 1>, scalar_prefetch = 0 : i64, scratch_operands = 0 : i64, tpu.core_type = #tpu.core_type<tc>, window_params = [{transform_indices = @transform_0, window_bounds = array<i64: 8, 4, 8, 128>}, {pipeline_mode = #tpu.pipeline_mode<synchronous>, transform_indices = @transform_1, window_bounds = array<i64: 4, 128, 256>}, {pipeline_mode = #tpu.pipeline_mode<synchronous>, transform_indices = @transform_2, window_bounds = array<i64: 1, 128>}, {pipeline_mode = #tpu.pipeline_mode<synchronous>, transform_indices = @transform_3, window_bounds = array<i64: 512, 128>}, {pipeline_mode = #tpu.pipeline_mode<synchronous>, transform_indices = @transform_4, window_bounds = array<i64: 1, 128>}, {pipeline_mode = #tpu.pipeline_mode<synchronous>, transform_indices = @transform_5, window_bounds = array<i64: 256, 256>}, {pipeline_mode = #tpu.pipeline_mode<synchronous>, transform_indices = @transform_6, window_bounds = array<i64: 1, 256>}, {pipeline_mode = #tpu.pipeline_mode<synchronous>, transform_indices = @transform_7, window_bounds = array<i64: 256, 128>}, {pipeline_mode = #tpu.pipeline_mode<synchronous>, transform_indices = @transform_8, window_bounds = array<i64: 1, 128>}, {transform_indices = @transform_9, window_bounds = array<i64: 8, 128>}]} {
    %c0 = arith.constant 0 : index
    %c0_0 = arith.constant 0 : index
    %c0_1 = arith.constant 0 : index
    %c0_2 = arith.constant 0 : index
    %0 = vector.load %arg1[%c0, %c0_0, %c0_1, %c0_2] : memref<8x4x8x128xf32, #tpu.memory_space<vmem>>, vector<8x1x8x128xf32>
    %1 = vector.shape_cast %0 : vector<8x1x8x128xf32> to vector<64x128xf32>
    %c0_3 = arith.constant 0 : index
    %c0_4 = arith.constant 0 : index
    %c0_5 = arith.constant 0 : index
    %2 = vector.load %arg2[%c0_3, %c0_4, %c0_5] : memref<4x128x256xf32, #tpu.memory_space<vmem>>, vector<1x128x256xf32>
    %3 = vector.shape_cast %2 : vector<1x128x256xf32> to vector<128x256xf32>
    %cst = arith.constant dense<0.000000e+00> : vector<64x256xf32>
    %4 = tpu.matmul %1, %3, %cst {dimension_numbers = #tpu.dot_dimension_numbers<[1], [0], [0], [1], [0, 0, 1, 1], [], []>} : vector<64x128xf32>, vector<128x256xf32>, vector<64x256xf32> -> vector<64x256xf32>
    %c0_6 = arith.constant 0 : index
    %c1 = arith.constant 1 : index
    %c0_7 = arith.constant 0 : index
    %c0_8 = arith.constant 0 : index
    %5 = vector.load %arg1[%c0_6, %c1, %c0_7, %c0_8] : memref<8x4x8x128xf32, #tpu.memory_space<vmem>>, vector<8x1x8x128xf32>
    %6 = vector.shape_cast %5 : vector<8x1x8x128xf32> to vector<64x128xf32>
    %c1_9 = arith.constant 1 : index
    %c0_10 = arith.constant 0 : index
    %c0_11 = arith.constant 0 : index
    %7 = vector.load %arg2[%c1_9, %c0_10, %c0_11] : memref<4x128x256xf32, #tpu.memory_space<vmem>>, vector<1x128x256xf32>
    %8 = vector.shape_cast %7 : vector<1x128x256xf32> to vector<128x256xf32>
    %cst_12 = arith.constant dense<0.000000e+00> : vector<64x256xf32>
    %9 = tpu.matmul %6, %8, %cst_12 {dimension_numbers = #tpu.dot_dimension_numbers<[1], [0], [0], [1], [0, 0, 1, 1], [], []>} : vector<64x128xf32>, vector<128x256xf32>, vector<64x256xf32> -> vector<64x256xf32>
    %10 = arith.addf %4, %9 : vector<64x256xf32>
    %c0_13 = arith.constant 0 : index
    %c2 = arith.constant 2 : index
    %c0_14 = arith.constant 0 : index
    %c0_15 = arith.constant 0 : index
    %11 = vector.load %arg1[%c0_13, %c2, %c0_14, %c0_15] : memref<8x4x8x128xf32, #tpu.memory_space<vmem>>, vector<8x1x8x128xf32>
    %12 = vector.shape_cast %11 : vector<8x1x8x128xf32> to vector<64x128xf32>
    %c2_16 = arith.constant 2 : index
    %c0_17 = arith.constant 0 : index
    %c0_18 = arith.constant 0 : index
    %13 = vector.load %arg2[%c2_16, %c0_17, %c0_18] : memref<4x128x256xf32, #tpu.memory_space<vmem>>, vector<1x128x256xf32>
    %14 = vector.shape_cast %13 : vector<1x128x256xf32> to vector<128x256xf32>
    %cst_19 = arith.constant dense<0.000000e+00> : vector<64x256xf32>
    %15 = tpu.matmul %12, %14, %cst_19 {dimension_numbers = #tpu.dot_dimension_numbers<[1], [0], [0], [1], [0, 0, 1, 1], [], []>} : vector<64x128xf32>, vector<128x256xf32>, vector<64x256xf32> -> vector<64x256xf32>
    %16 = arith.addf %10, %15 : vector<64x256xf32>
    %c0_20 = arith.constant 0 : index
    %c3 = arith.constant 3 : index
    %c0_21 = arith.constant 0 : index
    %c0_22 = arith.constant 0 : index
    %17 = vector.load %arg1[%c0_20, %c3, %c0_21, %c0_22] : memref<8x4x8x128xf32, #tpu.memory_space<vmem>>, vector<8x1x8x128xf32>
    %18 = vector.shape_cast %17 : vector<8x1x8x128xf32> to vector<64x128xf32>
    %c3_23 = arith.constant 3 : index
    %c0_24 = arith.constant 0 : index
    %c0_25 = arith.constant 0 : index
    %19 = vector.load %arg2[%c3_23, %c0_24, %c0_25] : memref<4x128x256xf32, #tpu.memory_space<vmem>>, vector<1x128x256xf32>
    %20 = vector.shape_cast %19 : vector<1x128x256xf32> to vector<128x256xf32>
    %cst_26 = arith.constant dense<0.000000e+00> : vector<64x256xf32>
    %21 = tpu.matmul %18, %20, %cst_26 {dimension_numbers = #tpu.dot_dimension_numbers<[1], [0], [0], [1], [0, 0, 1, 1], [], []>} : vector<64x128xf32>, vector<128x256xf32>, vector<64x256xf32> -> vector<64x256xf32>
    %22 = arith.addf %16, %21 : vector<64x256xf32>
    %23 = vector.shape_cast %22 : vector<64x256xf32> to vector<8x8x256xf32>
    %c0_27 = arith.constant 0 : index
    %c0_28 = arith.constant 0 : index
    %24 = vector.load %arg3[%c0_27, %c0_28] : memref<1x128xf32, #tpu.memory_space<vmem>>, vector<1x128xf32>
    %25 = vector.extract_strided_slice %23 {offsets = [0, 0, 0], sizes = [8, 1, 128], strides = [1, 1, 1]} : vector<8x8x256xf32> to vector<8x1x128xf32>
    %26 = vector.shape_cast %25 : vector<8x1x128xf32> to vector<8x128xf32>
    %27 = vector.extract_strided_slice %23 {offsets = [0, 1, 128], sizes = [8, 1, 128], strides = [1, 1, 1]} : vector<8x8x256xf32> to vector<8x1x128xf32>
    %28 = vector.shape_cast %27 : vector<8x1x128xf32> to vector<8x128xf32>
    %29 = arith.addf %26, %28 : vector<8x128xf32>
    %30 = vector.broadcast %24 : vector<1x128xf32> to vector<8x128xf32>
    %31 = arith.addf %29, %30 : vector<8x128xf32>
    %cst_29 = arith.constant 0.000000e+00 : f32
    %32 = vector.broadcast %cst_29 : f32 to vector<8x128xf32>
    %33 = arith.maximumf %31, %32 : vector<8x128xf32>
    %34 = vector.extract_strided_slice %23 {offsets = [0, 1, 0], sizes = [8, 1, 128], strides = [1, 1, 1]} : vector<8x8x256xf32> to vector<8x1x128xf32>
    %35 = vector.shape_cast %34 : vector<8x1x128xf32> to vector<8x128xf32>
    %36 = vector.extract_strided_slice %23 {offsets = [0, 2, 128], sizes = [8, 1, 128], strides = [1, 1, 1]} : vector<8x8x256xf32> to vector<8x1x128xf32>
    %37 = vector.shape_cast %36 : vector<8x1x128xf32> to vector<8x128xf32>
    %38 = arith.addf %35, %37 : vector<8x128xf32>
    %39 = vector.broadcast %24 : vector<1x128xf32> to vector<8x128xf32>
    %40 = arith.addf %38, %39 : vector<8x128xf32>
    %cst_30 = arith.constant 0.000000e+00 : f32
    %41 = vector.broadcast %cst_30 : f32 to vector<8x128xf32>
    %42 = arith.maximumf %40, %41 : vector<8x128xf32>
    %43 = vector.extract_strided_slice %23 {offsets = [0, 2, 0], sizes = [8, 1, 128], strides = [1, 1, 1]} : vector<8x8x256xf32> to vector<8x1x128xf32>
    %44 = vector.shape_cast %43 : vector<8x1x128xf32> to vector<8x128xf32>
    %45 = vector.extract_strided_slice %23 {offsets = [0, 3, 128], sizes = [8, 1, 128], strides = [1, 1, 1]} : vector<8x8x256xf32> to vector<8x1x128xf32>
    %46 = vector.shape_cast %45 : vector<8x1x128xf32> to vector<8x128xf32>
    %47 = arith.addf %44, %46 : vector<8x128xf32>
    %48 = vector.broadcast %24 : vector<1x128xf32> to vector<8x128xf32>
    %49 = arith.addf %47, %48 : vector<8x128xf32>
    %cst_31 = arith.constant 0.000000e+00 : f32
    %50 = vector.broadcast %cst_31 : f32 to vector<8x128xf32>
    %51 = arith.maximumf %49, %50 : vector<8x128xf32>
    %52 = vector.extract_strided_slice %23 {offsets = [0, 3, 0], sizes = [8, 1, 128], strides = [1, 1, 1]} : vector<8x8x256xf32> to vector<8x1x128xf32>
    %53 = vector.shape_cast %52 : vector<8x1x128xf32> to vector<8x128xf32>
    %54 = vector.extract_strided_slice %23 {offsets = [0, 4, 128], sizes = [8, 1, 128], strides = [1, 1, 1]} : vector<8x8x256xf32> to vector<8x1x128xf32>
    %55 = vector.shape_cast %54 : vector<8x1x128xf32> to vector<8x128xf32>
    %56 = arith.addf %53, %55 : vector<8x128xf32>
    %57 = vector.broadcast %24 : vector<1x128xf32> to vector<8x128xf32>
    %58 = arith.addf %56, %57 : vector<8x128xf32>
    %cst_32 = arith.constant 0.000000e+00 : f32
    %59 = vector.broadcast %cst_32 : f32 to vector<8x128xf32>
    %60 = arith.maximumf %58, %59 : vector<8x128xf32>
    %61 = vector.extract_strided_slice %23 {offsets = [0, 4, 0], sizes = [8, 1, 128], strides = [1, 1, 1]} : vector<8x8x256xf32> to vector<8x1x128xf32>
    %62 = vector.shape_cast %61 : vector<8x1x128xf32> to vector<8x128xf32>
    %63 = vector.extract_strided_slice %23 {offsets = [0, 5, 128], sizes = [8, 1, 128], strides = [1, 1, 1]} : vector<8x8x256xf32> to vector<8x1x128xf32>
    %64 = vector.shape_cast %63 : vector<8x1x128xf32> to vector<8x128xf32>
    %65 = arith.addf %62, %64 : vector<8x128xf32>
    %66 = vector.broadcast %24 : vector<1x128xf32> to vector<8x128xf32>
    %67 = arith.addf %65, %66 : vector<8x128xf32>
    %cst_33 = arith.constant 0.000000e+00 : f32
    %68 = vector.broadcast %cst_33 : f32 to vector<8x128xf32>
    %69 = arith.maximumf %67, %68 : vector<8x128xf32>
    %70 = vector.extract_strided_slice %23 {offsets = [0, 5, 0], sizes = [8, 1, 128], strides = [1, 1, 1]} : vector<8x8x256xf32> to vector<8x1x128xf32>
    %71 = vector.shape_cast %70 : vector<8x1x128xf32> to vector<8x128xf32>
    %72 = vector.extract_strided_slice %23 {offsets = [0, 6, 128], sizes = [8, 1, 128], strides = [1, 1, 1]} : vector<8x8x256xf32> to vector<8x1x128xf32>
    %73 = vector.shape_cast %72 : vector<8x1x128xf32> to vector<8x128xf32>
    %74 = arith.addf %71, %73 : vector<8x128xf32>
    %75 = vector.broadcast %24 : vector<1x128xf32> to vector<8x128xf32>
    %76 = arith.addf %74, %75 : vector<8x128xf32>
    %cst_34 = arith.constant 0.000000e+00 : f32
    %77 = vector.broadcast %cst_34 : f32 to vector<8x128xf32>
    %78 = arith.maximumf %76, %77 : vector<8x128xf32>
    %c0_35 = arith.constant 0 : index
    %c0_36 = arith.constant 0 : index
    %79 = vector.load %arg4[%c0_35, %c0_36] : memref<512x128xf32, #tpu.memory_space<vmem>>, vector<512x128xf32>
    %c0_37 = arith.constant 0 : index
    %c0_38 = arith.constant 0 : index
    %80 = vector.load %arg5[%c0_37, %c0_38] : memref<1x128xf32, #tpu.memory_space<vmem>>, vector<1x128xf32>
    %81 = tpu.concatenate %33, %42, %51, %60 in 1 : vector<8x128xf32>, vector<8x128xf32>, vector<8x128xf32>, vector<8x128xf32> -> vector<8x512xf32>
    %cst_39 = arith.constant dense<0.000000e+00> : vector<8x128xf32>
    %82 = tpu.matmul %81, %79, %cst_39 {dimension_numbers = #tpu.dot_dimension_numbers<[1], [0], [0], [1], [0, 0, 1, 1], [], []>} : vector<8x512xf32>, vector<512x128xf32>, vector<8x128xf32> -> vector<8x128xf32>
    %83 = vector.broadcast %80 : vector<1x128xf32> to vector<8x128xf32>
    %84 = arith.addf %82, %83 : vector<8x128xf32>
    %cst_40 = arith.constant 0.000000e+00 : f32
    %85 = vector.broadcast %cst_40 : f32 to vector<8x128xf32>
    %86 = arith.maximumf %84, %85 : vector<8x128xf32>
    %87 = tpu.concatenate %51, %60, %69, %78 in 1 : vector<8x128xf32>, vector<8x128xf32>, vector<8x128xf32>, vector<8x128xf32> -> vector<8x512xf32>
    %cst_41 = arith.constant dense<0.000000e+00> : vector<8x128xf32>
    %88 = tpu.matmul %87, %79, %cst_41 {dimension_numbers = #tpu.dot_dimension_numbers<[1], [0], [0], [1], [0, 0, 1, 1], [], []>} : vector<8x512xf32>, vector<512x128xf32>, vector<8x128xf32> -> vector<8x128xf32>
    %89 = vector.broadcast %80 : vector<1x128xf32> to vector<8x128xf32>
    %90 = arith.addf %88, %89 : vector<8x128xf32>
    %cst_42 = arith.constant 0.000000e+00 : f32
    %91 = vector.broadcast %cst_42 : f32 to vector<8x128xf32>
    %92 = arith.maximumf %90, %91 : vector<8x128xf32>
    %93 = tpu.concatenate %86, %92 in 1 : vector<8x128xf32>, vector<8x128xf32> -> vector<8x256xf32>
    %c0_43 = arith.constant 0 : index
    %c0_44 = arith.constant 0 : index
    %94 = vector.load %arg6[%c0_43, %c0_44] : memref<256x256xf32, #tpu.memory_space<vmem>>, vector<256x256xf32>
    %cst_45 = arith.constant dense<0.000000e+00> : vector<8x256xf32>
    %95 = tpu.matmul %93, %94, %cst_45 {dimension_numbers = #tpu.dot_dimension_numbers<[1], [0], [0], [1], [0, 0, 1, 1], [], []>} : vector<8x256xf32>, vector<256x256xf32>, vector<8x256xf32> -> vector<8x256xf32>
    %c0_46 = arith.constant 0 : index
    %c0_47 = arith.constant 0 : index
    %96 = vector.load %arg7[%c0_46, %c0_47] : memref<1x256xf32, #tpu.memory_space<vmem>>, vector<1x256xf32>
    %97 = vector.broadcast %96 : vector<1x256xf32> to vector<8x256xf32>
    %98 = arith.addf %95, %97 : vector<8x256xf32>
    %cst_48 = arith.constant 0.000000e+00 : f32
    %99 = vector.broadcast %cst_48 : f32 to vector<8x256xf32>
    %100 = arith.maximumf %98, %99 : vector<8x256xf32>
    %c0_49 = arith.constant 0 : index
    %c0_50 = arith.constant 0 : index
    %101 = vector.load %arg8[%c0_49, %c0_50] : memref<256x128xf32, #tpu.memory_space<vmem>>, vector<256x128xf32>
    %cst_51 = arith.constant dense<0.000000e+00> : vector<8x128xf32>
    %102 = tpu.matmul %100, %101, %cst_51 {dimension_numbers = #tpu.dot_dimension_numbers<[1], [0], [0], [1], [0, 0, 1, 1], [], []>} : vector<8x256xf32>, vector<256x128xf32>, vector<8x128xf32> -> vector<8x128xf32>
    %c0_52 = arith.constant 0 : index
    %c0_53 = arith.constant 0 : index
    %103 = vector.load %arg9[%c0_52, %c0_53] : memref<1x128xf32, #tpu.memory_space<vmem>>, vector<1x128xf32>
    %104 = vector.broadcast %103 : vector<1x128xf32> to vector<8x128xf32>
    %105 = arith.addf %102, %104 : vector<8x128xf32>
    %106 = tpu.iota {dimensions = array<i32: 1>} : vector<8x128xi32>
    %cst_54 = arith.constant 0.000000e+00 : f32
    %107 = vector.broadcast %cst_54 : f32 to vector<8x128xf32>
    %108 = arith.subf %107, %105 : vector<8x128xf32>
    %109 = math.exp %108 : vector<8x128xf32>
    %cst_55 = arith.constant 1.000000e+00 : f32
    %110 = vector.broadcast %cst_55 : f32 to vector<8x128xf32>
    %111 = arith.addf %110, %109 : vector<8x128xf32>
    %cst_56 = arith.constant 1.000000e+00 : f32
    %112 = vector.broadcast %cst_56 : f32 to vector<8x128xf32>
    %113 = arith.divf %112, %111 : vector<8x128xf32>
    %c0_i32 = arith.constant 0 : i32
    %114 = vector.broadcast %c0_i32 : i32 to vector<8x128xi32>
    %115 = arith.cmpi eq, %106, %114 : vector<8x128xi32>
    %116 = arith.select %115, %113, %105 : vector<8x128xi1>, vector<8x128xf32>
    %c0_57 = arith.constant 0 : index
    %c0_58 = arith.constant 0 : index
    %117 = vector.load %arg10[%c0_57, %c0_58] : memref<8x128xf32, #tpu.memory_space<vmem>>, vector<8x128xf32>
    tpu.vector_store %arg10[%c0_57, %c0_58], %116 {strides = array<i32>} : memref<8x128xf32, #tpu.memory_space<vmem>>, vector<8x128xf32>,
    return
  }
  func.func @transform_0(%arg0: i32) -> (i32, i32, i32, i32) {
    %c0_i32 = arith.constant 0 : i32
    %c0_i32_0 = arith.constant 0 : i32
    %c0_i32_1 = arith.constant 0 : i32
    %c0_i32_2 = arith.constant 0 : i32
    return %arg0, %c0_i32, %c0_i32_0, %c0_i32_1 : i32, i32, i32, i32
  }
  func.func @transform_1(%arg0: i32) -> (i32, i32, i32) {
    %c0_i32 = arith.constant 0 : i32
    %c0_i32_0 = arith.constant 0 : i32
    %c0_i32_1 = arith.constant 0 : i32
    %c0_i32_2 = arith.constant 0 : i32
    return %c0_i32, %c0_i32_0, %c0_i32_1 : i32, i32, i32
  }
  func.func @transform_2(%arg0: i32) -> (i32, i32) {
    %c0_i32 = arith.constant 0 : i32
    %c0_i32_0 = arith.constant 0 : i32
    %c0_i32_1 = arith.constant 0 : i32
    return %c0_i32, %c0_i32_0 : i32, i32
  }
  func.func @transform_3(%arg0: i32) -> (i32, i32) {
    %c0_i32 = arith.constant 0 : i32
    %c0_i32_0 = arith.constant 0 : i32
    %c0_i32_1 = arith.constant 0 : i32
    return %c0_i32, %c0_i32_0 : i32, i32
  }
  func.func @transform_4(%arg0: i32) -> (i32, i32) {
    %c0_i32 = arith.constant 0 : i32
    %c0_i32_0 = arith.constant 0 : i32
    %c0_i32_1 = arith.constant 0 : i32
    return %c0_i32, %c0_i32_0 : i32, i32
  }
  func.func @transform_5(%arg0: i32) -> (i32, i32) {
    %c0_i32 = arith.constant 0 : i32
    %c0_i32_0 = arith.constant 0 : i32
    %c0_i32_1 = arith.constant 0 : i32
    return %c0_i32, %c0_i32_0 : i32, i32
  }
  func.func @transform_6(%arg0: i32) -> (i32, i32) {
    %c0_i32 = arith.constant 0 : i32
    %c0_i32_0 = arith.constant 0 : i32
    %c0_i32_1 = arith.constant 0 : i32
    return %c0_i32, %c0_i32_0 : i32, i32
  }
  func.func @transform_7(%arg0: i32) -> (i32, i32) {
    %c0_i32 = arith.constant 0 : i32
    %c0_i32_0 = arith.constant 0 : i32
    %c0_i32_1 = arith.constant 0 : i32
    return %c0_i32, %c0_i32_0 : i32, i32
  }
  func.func @transform_8(%arg0: i32) -> (i32, i32) {
    %c0_i32 = arith.constant 0 : i32
    %c0_i32_0 = arith.constant 0 : i32
    %c0_i32_1 = arith.constant 0 : i32
    return %c0_i32, %c0_i32_0 : i32, i32
  }
  func.func @transform_9(%arg0: i32) -> (i32, i32) {
    %c0_i32 = arith.constant 0 : i32
    %c0_i32_0 = arith.constant 0 : i32
    return %arg0, %c0_i32 : i32, i32
  }
}

</mosaic_0001>

<bundles_post_ra>
// kernel: actor_critic_forward.1
= control target key start
LH: loop header
LB: loop body
LE: loop exit
PB: predicated region body
PF: predicated region fallthrough
CT: control target
= control target key end

     0   :  { %v1782_v3 = vmov 0.0   ;;  %vm811_vm0 = vcmask 1041409   ;;  %vm817_vm1 = vcmask 1043459   ;;  %vm814_vm2 = vcmask 1042434   ;;  %s3319_s1 = inlined_call_operand.vmem [shape: f32[4,128,256], index: 1, kind: input, shape index: {}]   ;;  %s3320_s0 = inlined_call_operand.vmem [shape: f32[8,4,8,128], index: 0, kind: input, shape index: {}]   ;;  %s3321_s3 = inlined_call_operand.vmem [shape: f32[512,128], index: 3, kind: input, shape index: {}]   ;;  %s3322_s2 = inlined_call_operand.vmem [shape: f32[1,128], index: 2, kind: input, shape index: {}]   ;;  %s3323_s5 = inlined_call_operand.vmem [shape: f32[256,256], index: 5, kind: input, shape index: {}]   ;;  %s3324_s7 = inlined_call_operand.vmem [shape: f32[256,128], index: 7, kind: input, shape index: {}]   ;;  %s3325_s4 = inlined_call_operand.vmem [shape: f32[1,128], index: 4, kind: input, shape index: {}]   ;;  %s3326_s6 = inlined_call_operand.vmem [shape: f32[1,256], index: 6, kind: input, shape index: {}]   ;;  %s3327_s8 = inlined_call_operand.vmem [shape: f32[1,128], index: 8, kind: input, shape index: {}]   ;;  %s3328_s9 = inlined_call_operand.vmem [shape: f32[8,128], index: 9, kind: output, shape index: {}]  }
   0x1   :  { %v1518_v0 = vld [vmem:[%s3319_s1 + $0x1f8] sm:$0xff]  ;;  %v1517_v2 = vld [vmem:[%s3319_s1 + $0x1f0] sm:$0xff]  ;;  %178 = vmatprep.mubr.f32.mxu0 %v1782_v3  ;;  %291 = vmatprep.mubr.f32.mxu1 %v1782_v3  ;;  %v1516_v5 = vld [vmem:[%s3319_s1 + $0x1e8] sm:$0xff]  ;;  %vm820_vm3 = vcmask 1044484   ;;  %vm823_vm4 = vcmask 1045509   ;;  %vm826_vm5 = vcmask 1046534  }
   0x2   :  { %v71_v1 = vld [vmem:[%s3319_s1 + $0xf8] sm:$0xff]  ;;  %114 = vmatprep.subr.mxu0 %v1518_v0  ;;  %v70_v4 = vld [vmem:[%s3319_s1 + $0xf0] sm:$0xff]  ;;  %v69_v6 = vld [vmem:[%s3319_s1 + $0xe8] sm:$0xff]  ;;  %vm829_vm6 = vcmask 1047559   ;;  %vm1048_vm7 = vcmask 1045504  }
   0x3   :  { %227 = vmatprep.subr.mxu1 %v71_v1  ;;  %115 = vmatpush1.msra.mxu0 %v1517_v2  ;;  %v1515_v7 = vld [vmem:[%s3319_s1 + $0x1e0] sm:$0xff]  ;;  %v1514_v9 = vld [vmem:[%s3319_s1 + $0x1d8] sm:$0xff]  ;;  %v1513_v11 = vld [vmem:[%s3319_s1 + $0x1d0] sm:$0xff] }
   0x4   :  { %228 = vmatpush1.msra.mxu1 %v70_v4  ;;  %v68_v8 = vld [vmem:[%s3319_s1 + $0xe0] sm:$0xff]  ;;  %116 = vmatprep.subr.mxu0 %v1516_v5  ;;  %v67_v10 = vld [vmem:[%s3319_s1 + $0xd8] sm:$0xff]  ;;  %v66_v12 = vld [vmem:[%s3319_s1 + $0xd0] sm:$0xff] }
   0x5   :  { %229 = vmatprep.subr.mxu1 %v69_v6  ;;  %117 = vmatpush1.msra.mxu0 %v1515_v7  ;;  %v1512_v13 = vld [vmem:[%s3319_s1 + $0x1c8] sm:$0xff]  ;;  %v1511_v15 = vld [vmem:[%s3319_s1 + $0x1c0] sm:$0xff]  ;;  %v1510_v17 = vld [vmem:[%s3319_s1 + $0x1b8] sm:$0xff] }
   0x6   :  { %230 = vmatpush1.msra.mxu1 %v68_v8  ;;  %v65_v14 = vld [vmem:[%s3319_s1 + $0xc8] sm:$0xff]  ;;  %118 = vmatprep.subr.mxu0 %v1514_v9  ;;  %v64_v16 = vld [vmem:[%s3319_s1 + $0xc0] sm:$0xff]  ;;  %v63_v18 = vld [vmem:[%s3319_s1 + $0xb8] sm:$0xff] }
   0x7   :  { %231 = vmatprep.subr.mxu1 %v67_v10  ;;  %119 = vmatpush1.msra.mxu0 %v1513_v11  ;;  %v1509_v19 = vld [vmem:[%s3319_s1 + $0x1b0] sm:$0xff]  ;;  %v1508_v21 = vld [vmem:[%s3319_s1 + $0x1a8] sm:$0xff]  ;;  %v1507_v23 = vld [vmem:[%s3319_s1 + $0x1a0] sm:$0xff] }
   0x8   :  { %232 = vmatpush1.msra.mxu1 %v66_v12  ;;  %120 = vmatprep.subr.mxu0 %v1512_v13  ;;  %v62_v20 = vld [vmem:[%s3319_s1 + $0xb0] sm:$0xff]  ;;  %v61_v22 = vld [vmem:[%s3319_s1 + $0xa8] sm:$0xff]  ;;  %v60_v24 = vld [vmem:[%s3319_s1 + $0xa0] sm:$0xff] }
   0x9   :  { %233 = vmatprep.subr.mxu1 %v65_v14  ;;  %121 = vmatpush1.msra.mxu0 %v1511_v15  ;;  %v1506_v25 = vld [vmem:[%s3319_s1 + $0x198] sm:$0xff]  ;;  %v1505_v27 = vld [vmem:[%s3319_s1 + $0x190] sm:$0xff]  ;;  %v1504_v29 = vld [vmem:[%s3319_s1 + $0x188] sm:$0xff] }
   0xa   :  { %234 = vmatpush1.msra.mxu1 %v64_v16  ;;  %122 = vmatprep.subr.mxu0 %v1510_v17  ;;  %v59_v26 = vld [vmem:[%s3319_s1 + $0x98] sm:$0xff]  ;;  %v58_v28 = vld [vmem:[%s3319_s1 + $0x90] sm:$0xff]  ;;  %v57_v30 = vld [vmem:[%s3319_s1 + $0x88] sm:$0xff] }
   0xb   :  { %235 = vmatprep.subr.mxu1 %v63_v18  ;;  %123 = vmatpush1.msra.mxu0 %v1509_v19  ;;  %v1503_v31 = vld [vmem:[%s3319_s1 + $0x180] sm:$0xff]  ;;  %v1502_v33 = vld [vmem:[%s3319_s1 + $0x178] sm:$0xff]  ;;  %v1501_v35 = vld [vmem:[%s3319_s1 + $0x170] sm:$0xff] }
   0xc   :  { %236 = vmatpush1.msra.mxu1 %v62_v20  ;;  %124 = vmatprep.subr.mxu0 %v1508_v21  ;;  %v56_v32 = vld [vmem:[%s3319_s1 + $0x80] sm:$0xff]  ;;  %v55_v34 = vld [vmem:[%s3319_s1 + $0x78] sm:$0xff]  ;;  %v54_v36 = vld [vmem:[%s3319_s1 + $0x70] sm:$0xff] }
   0xd   :  { %237 = vmatprep.subr.mxu1 %v61_v22  ;;  %125 = vmatpush1.msra.mxu0 %v1507_v23  ;;  %v1500_v37 = vld [vmem:[%s3319_s1 + $0x168] sm:$0xff]  ;;  %v1499_v39 = vld [vmem:[%s3319_s1 + $0x160] sm:$0xff]  ;;  %v1498_v41 = vld [vmem:[%s3319_s1 + $0x158] sm:$0xff] }
   0xe   :  { %238 = vmatpush1.msra.mxu1 %v60_v24  ;;  %126 = vmatprep.subr.mxu0 %v1506_v25  ;;  %v53_v38 = vld [vmem:[%s3319_s1 + $0x68] sm:$0xff]  ;;  %v52_v40 = vld [vmem:[%s3319_s1 + $0x60] sm:$0xff]  ;;  %v51_v42 = vld [vmem:[%s3319_s1 + $0x58] sm:$0xff] }
   0xf   :  { %239 = vmatprep.subr.mxu1 %v59_v26  ;;  %127 = vmatpush1.msra.mxu0 %v1505_v27  ;;  %v1497_v43 = vld [vmem:[%s3319_s1 + $0x150] sm:$0xff]  ;;  %v1496_v45 = vld [vmem:[%s3319_s1 + $0x148] sm:$0xff]  ;;  %v1495_v47 = vld [vmem:[%s3319_s1 + $0x140] sm:$0xff] }
  0x10   :  { %240 = vmatpush1.msra.mxu1 %v58_v28  ;;  %128 = vmatprep.subr.mxu0 %v1504_v29  ;;  %v50_v44 = vld [vmem:[%s3319_s1 + $0x50] sm:$0xff]  ;;  %v49_v46 = vld [vmem:[%s3319_s1 + $0x48] sm:$0xff]  ;;  %v48_v48 = vld [vmem:[%s3319_s1 + $0x40] sm:$0xff] }
  0x11   :  { %241 = vmatprep.subr.mxu1 %v57_v30  ;;  %129 = vmatpush1.msra.mxu0 %v1503_v31  ;;  %v1494_v49 = vld [vmem:[%s3319_s1 + $0x138] sm:$0xff]  ;;  %v1493_v51 = vld [vmem:[%s3319_s1 + $0x130] sm:$0xff]  ;;  %v1492_v53 = vld [vmem:[%s3319_s1 + $0x128] sm:$0xff] }
  0x12   :  { %242 = vmatpush1.msra.mxu1 %v56_v32  ;;  %130 = vmatprep.subr.mxu0 %v1502_v33  ;;  %v47_v50 = vld [vmem:[%s3319_s1 + $0x38] sm:$0xff]  ;;  %v46_v52 = vld [vmem:[%s3319_s1 + $0x30] sm:$0xff]  ;;  %v45_v54 = vld [vmem:[%s3319_s1 + $0x28] sm:$0xff] }
  0x13   :  { %243 = vmatprep.subr.mxu1 %v55_v34  ;;  %131 = vmatpush1.msra.mxu0 %v1501_v35  ;;  %v1491_v55 = vld [vmem:[%s3319_s1 + $0x120] sm:$0xff]  ;;  %v1490_v57 = vld [vmem:[%s3319_s1 + $0x118] sm:$0xff]  ;;  %v1489_v59 = vld [vmem:[%s3319_s1 + $0x110] sm:$0xff] }
  0x14   :  { %244 = vmatpush1.msra.mxu1 %v54_v36  ;;  %132 = vmatprep.subr.mxu0 %v1500_v37  ;;  %v44_v56 = vld [vmem:[%s3319_s1 + $0x20] sm:$0xff]  ;;  %v43_v58 = vld [vmem:[%s3319_s1 + $0x18] sm:$0xff]  ;;  %v42_v60 = vld [vmem:[%s3319_s1 + $0x10] sm:$0xff] }
  0x15   :  { %245 = vmatprep.subr.mxu1 %v53_v38  ;;  %133 = vmatpush1.msra.mxu0 %v1499_v39  ;;  %v1488_v61 = vld [vmem:[%s3319_s1 + $0x108] sm:$0xff]  ;;  %v1487_v63 = vld [vmem:[%s3319_s1 + $0x100] sm:$0xff]  ;;  %v1558_v4 = vld [vmem:[%s3319_s1 + $0x2f8] sm:$0xff] }
  0x16   :  { %246 = vmatpush1.msra.mxu1 %v52_v40  ;;  %134 = vmatprep.subr.mxu0 %v1498_v41  ;;  %v41_v62 = vld [vmem:[%s3319_s1 + $0x8] sm:$0xff]  ;;  %v40_v0 = vld [vmem:[%s3319_s1] sm:$0xff]  ;;  %v1598_v5 = vld [vmem:[%s3319_s1 + $0x3f8] sm:$0xff] }
  0x17   :  { %247 = vmatprep.subr.mxu1 %v51_v42  ;;  %135 = vmatpush1.msra.mxu0 %v1497_v43  ;;  %v1479_v1 = vld [vmem:[%s3320_s0 + $0x8] sm:$0xff]  ;;  %v32_v2 = vld [vmem:[%s3320_s0] sm:$0xff]  ;;  %v1557_v6 = vld [vmem:[%s3319_s1 + $0x2f0] sm:$0xff] }
  0x18   :  { %248 = vmatpush1.msra.mxu1 %v50_v44  ;;  %136 = vmatprep.subr.mxu0 %v1496_v45  ;;  %v1597_v7 = vld [vmem:[%s3319_s1 + $0x3f0] sm:$0xff]  ;;  %v1556_v8 = vld [vmem:[%s3319_s1 + $0x2e8] sm:$0xff]  ;;  %v1555_v9 = vld [vmem:[%s3319_s1 + $0x2e0] sm:$0xff] }
  0x19   :  { %249 = vmatprep.subr.mxu1 %v49_v46  ;;  %137 = vmatpush1.msra.mxu0 %v1495_v47  ;;  %v1596_v10 = vld [vmem:[%s3319_s1 + $0x3e8] sm:$0xff]  ;;  %v33_v12 = vld [vmem:[%s3320_s0 + $0x20] sm:$0xff]  ;;  %v1554_v13 = vld [vmem:[%s3319_s1 + $0x2d8] sm:$0xff] }
  0x1a   :  { %250 = vmatpush1.msra.mxu1 %v48_v48  ;;  %138 = vmatprep.subr.mxu0 %v1494_v49  ;;  %v1480_v11 = vld [vmem:[%s3320_s0 + $0x28] sm:$0xff]  ;;  %v1595_v14 = vld [vmem:[%s3319_s1 + $0x3e0] sm:$0xff]  ;;  %v1553_v15 = vld [vmem:[%s3319_s1 + $0x2d0] sm:$0xff] }
  0x1b   :  { %251 = vmatprep.subr.mxu1 %v47_v50  ;;  %139 = vmatpush1.msra.mxu0 %v1493_v51  ;;  %v1594_v16 = vld [vmem:[%s3319_s1 + $0x3d8] sm:$0xff]  ;;  %v1552_v17 = vld [vmem:[%s3319_s1 + $0x2c8] sm:$0xff]  ;;  %v1593_v18 = vld [vmem:[%s3319_s1 + $0x3d0] sm:$0xff] }
  0x1c   :  { %252 = vmatpush1.msra.mxu1 %v46_v52  ;;  %140 = vmatprep.subr.mxu0 %v1492_v53  ;;  %v1551_v19 = vld [vmem:[%s3319_s1 + $0x2c0] sm:$0xff]  ;;  %v1592_v20 = vld [vmem:[%s3319_s1 + $0x3c8] sm:$0xff]  ;;  %v1550_v23 = vld [vmem:[%s3319_s1 + $0x2b8] sm:$0xff] }
  0x1d   :  { %253 = vmatprep.subr.mxu1 %v45_v54  ;;  %141 = vmatpush1.msra.mxu0 %v1491_v55  ;;  %v1481_v21 = vld [vmem:[%s3320_s0 + $0x48] sm:$0xff]  ;;  %v34_v22 = vld [vmem:[%s3320_s0 + $0x40] sm:$0xff]  ;;  %v1549_v25 = vld [vmem:[%s3319_s1 + $0x2b0] sm:$0xff] }
  0x1e   :  { %254 = vmatpush1.msra.mxu1 %v44_v56  ;;  %142 = vmatprep.subr.mxu0 %v1490_v57  ;;  %v1591_v24 = vld [vmem:[%s3319_s1 + $0x3c0] sm:$0xff]  ;;  %v1590_v26 = vld [vmem:[%s3319_s1 + $0x3b8] sm:$0xff]  ;;  %v1548_v27 = vld [vmem:[%s3319_s1 + $0x2a8] sm:$0xff] }
  0x1f   :  { %255 = vmatprep.subr.mxu1 %v43_v58  ;;  %143 = vmatpush1.msra.mxu0 %v1489_v59  ;;  %v1589_v28 = vld [vmem:[%s3319_s1 + $0x3b0] sm:$0xff]  ;;  %v1547_v29 = vld [vmem:[%s3319_s1 + $0x2a0] sm:$0xff]  ;;  %v1588_v30 = vld [vmem:[%s3319_s1 + $0x3a8] sm:$0xff] }
  0x20   :  { %256 = vmatpush1.msra.mxu1 %v42_v60  ;;  %144 = vmatprep.subr.mxu0 %v1488_v61  ;;  %v1482_v31 = vld [vmem:[%s3320_s0 + $0x68] sm:$0xff]  ;;  %v35_v32 = vld [vmem:[%s3320_s0 + $0x60] sm:$0xff]  ;;  %v1546_v33 = vld [vmem:[%s3319_s1 + $0x298] sm:$0xff] }
  0x21   :  { %257 = vmatprep.subr.mxu1 %v41_v62  ;;  %145 = vmatpush1.msra.mxu0 %v1487_v63  ;;  %v1587_v34 = vld [vmem:[%s3319_s1 + $0x3a0] sm:$0xff]  ;;  %v1545_v35 = vld [vmem:[%s3319_s1 + $0x290] sm:$0xff]  ;;  %v1586_v36 = vld [vmem:[%s3319_s1 + $0x398] sm:$0xff] }
  0x22   :  { %258 = vmatpush1.msra.mxu1 %v40_v0  ;;  %179 = vmatmul.mubr.f32.vlgmr.msra.gmra.mxu0 %v1479_v1  ;;  %v1544_v37 = vld [vmem:[%s3319_s1 + $0x288] sm:$0xff]  ;;  %v1585_v38 = vld [vmem:[%s3319_s1 + $0x390] sm:$0xff]  ;;  %v1543_v39 = vld [vmem:[%s3319_s1 + $0x280] sm:$0xff] }
  0x23   :  { %292 = vmatmul.mubr.f32.vlgmr.msra.gmra.mxu1 %v32_v2  ;;  %382 = vmatprep.subr.mxu0 %v1558_v4  ;;  %v1584_v40 = vld [vmem:[%s3319_s1 + $0x388] sm:$0xff]  ;;  %v36_v42 = vld [vmem:[%s3320_s0 + $0x80] sm:$0xff]  ;;  %v1542_v43 = vld [vmem:[%s3319_s1 + $0x278] sm:$0xff] }
  0x24   :  { %553 = vmatprep.subr.mxu1 %v1598_v5  ;;  %383 = vmatpush1.msra.mxu0 %v1557_v6  ;;  %v1483_v41 = vld [vmem:[%s3320_s0 + $0x88] sm:$0xff]  ;;  %v1583_v44 = vld [vmem:[%s3319_s1 + $0x380] sm:$0xff]  ;;  %v1541_v45 = vld [vmem:[%s3319_s1 + $0x270] sm:$0xff] }
  0x25   :  { %554 = vmatpush1.msra.mxu1 %v1597_v7  ;;  %384 = vmatprep.subr.mxu0 %v1556_v8  ;;  %v1582_v46 = vld [vmem:[%s3319_s1 + $0x378] sm:$0xff]  ;;  %v1540_v47 = vld [vmem:[%s3319_s1 + $0x268] sm:$0xff]  ;;  %v1581_v48 = vld [vmem:[%s3319_s1 + $0x370] sm:$0xff] }
  0x26   :  { %184 = vmatprep.mubr.f32.mxu0 %v1782_v3  ;;  %297 = vmatprep.mubr.f32.mxu1 %v1782_v3  ;;  %v1539_v49 = vld [vmem:[%s3319_s1 + $0x260] sm:$0xff]  ;;  %v1580_v50 = vld [vmem:[%s3319_s1 + $0x368] sm:$0xff]  ;;  %v1538_v53 = vld [vmem:[%s3319_s1 + $0x258] sm:$0xff] }
  0x27   :  { %385 = vmatpush1.msra.mxu0 %v1555_v9  ;;  %555 = vmatprep.subr.mxu1 %v1596_v10  ;;  %v1484_v51 = vld [vmem:[%s3320_s0 + $0xa8] sm:$0xff]  ;;  %v37_v52 = vld [vmem:[%s3320_s0 + $0xa0] sm:$0xff]  ;;  %v1537_v55 = vld [vmem:[%s3319_s1 + $0x250] sm:$0xff] }
  0x28   :  { %185 = vmatmul.mubr.f32.gmra.mxu0 %v1480_v11  ;;  %298 = vmatmul.mubr.f32.gmra.mxu1 %v33_v12  ;;  %v1579_v54 = vld [vmem:[%s3319_s1 + $0x360] sm:$0xff]  ;;  %v1578_v56 = vld [vmem:[%s3319_s1 + $0x358] sm:$0xff]  ;;  %v1536_v57 = vld [vmem:[%s3319_s1 + $0x248] sm:$0xff] }
  0x29   :  { %386 = vmatprep.subr.mxu0 %v1554_v13  ;;  %556 = vmatpush1.msra.mxu1 %v1595_v14  ;;  %v1577_v58 = vld [vmem:[%s3319_s1 + $0x350] sm:$0xff]  ;;  %v1535_v59 = vld [vmem:[%s3319_s1 + $0x240] sm:$0xff]  ;;  %v1576_v60 = vld [vmem:[%s3319_s1 + $0x348] sm:$0xff] }
  0x2a   :  { %387 = vmatpush1.msra.mxu0 %v1553_v15  ;;  %557 = vmatprep.subr.mxu1 %v1594_v16  ;;  %v1485_v61 = vld [vmem:[%s3320_s0 + $0xc8] sm:$0xff]  ;;  %v38_v62 = vld [vmem:[%s3320_s0 + $0xc0] sm:$0xff]  ;;  %v1534_v63 = vld [vmem:[%s3319_s1 + $0x238] sm:$0xff] }
  0x2b   :  { %388 = vmatprep.subr.mxu0 %v1552_v17  ;;  %558 = vmatpush1.msra.mxu1 %v1593_v18  ;;  %v1575_v0 = vld [vmem:[%s3319_s1 + $0x340] sm:$0xff]  ;;  %v1533_v1 = vld [vmem:[%s3319_s1 + $0x230] sm:$0xff]  ;;  %v1574_v2 = vld [vmem:[%s3319_s1 + $0x338] sm:$0xff] }
  0x2c   :  { %190 = vmatprep.mubr.f32.mxu0 %v1782_v3  ;;  %303 = vmatprep.mubr.f32.mxu1 %v1782_v3  ;;  %v1532_v4 = vld [vmem:[%s3319_s1 + $0x228] sm:$0xff]  ;;  %v1573_v5 = vld [vmem:[%s3319_s1 + $0x330] sm:$0xff]  ;;  %v1531_v6 = vld [vmem:[%s3319_s1 + $0x220] sm:$0xff] }
  0x2d   :  { %389 = vmatpush1.msra.mxu0 %v1551_v19  ;;  %559 = vmatprep.subr.mxu1 %v1592_v20  ;;  %v1572_v7 = vld [vmem:[%s3319_s1 + $0x328] sm:$0xff]  ;;  %v39_v9 = vld [vmem:[%s3320_s0 + $0xe0] sm:$0xff]  ;;  %v1530_v10 = vld [vmem:[%s3319_s1 + $0x218] sm:$0xff] }
  0x2e   :  { %191 = vmatmul.mubr.f32.gmra.mxu0 %v1481_v21  ;;  %304 = vmatmul.mubr.f32.gmra.mxu1 %v34_v22  ;;  %v1486_v8 = vld [vmem:[%s3320_s0 + $0xe8] sm:$0xff]  ;;  %v1571_v11 = vld [vmem:[%s3319_s1 + $0x320] sm:$0xff]  ;;  %v1529_v12 = vld [vmem:[%s3319_s1 + $0x210] sm:$0xff] }
  0x2f   :  { %390 = vmatprep.subr.mxu0 %v1550_v23  ;;  %560 = vmatpush1.msra.mxu1 %v1591_v24  ;;  %v1570_v13 = vld [vmem:[%s3319_s1 + $0x318] sm:$0xff]  ;;  %v1528_v14 = vld [vmem:[%s3319_s1 + $0x208] sm:$0xff]  ;;  %v1569_v15 = vld [vmem:[%s3319_s1 + $0x310] sm:$0xff] }
  0x30   :  { %391 = vmatpush1.msra.mxu0 %v1549_v25  ;;  %561 = vmatprep.subr.mxu1 %v1590_v26  ;;  %v1527_v16 = vld [vmem:[%s3319_s1 + $0x200] sm:$0xff]  ;;  %v1568_v17 = vld [vmem:[%s3319_s1 + $0x308] sm:$0xff]  ;;  %v1519_v18 = vld [vmem:[%s3320_s0 + $0x10] sm:$0xff] }
  0x31   :  { %392 = vmatprep.subr.mxu0 %v1548_v27  ;;  %562 = vmatpush1.msra.mxu1 %v1589_v28  ;;  %v1567_v19 = vld [vmem:[%s3319_s1 + $0x300] sm:$0xff]  ;;  %v1559_v20 = vld [vmem:[%s3320_s0 + $0x18] sm:$0xff]  ;;  %v1520_v21 = vld [vmem:[%s3320_s0 + $0x30] sm:$0xff] }
  0x32   :  { %196 = vmatprep.mubr.f32.mxu0 %v1782_v3  ;;  %309 = vmatprep.mubr.f32.mxu1 %v1782_v3  ;;  %v1560_v22 = vld [vmem:[%s3320_s0 + $0x38] sm:$0xff]  ;;  %v1521_v23 = vld [vmem:[%s3320_s0 + $0x50] sm:$0xff] }
  0x33   :  { %393 = vmatpush1.msra.mxu0 %v1547_v29  ;;  %563 = vmatprep.subr.mxu1 %v1588_v30  ;;  %v1561_v24 = vld [vmem:[%s3320_s0 + $0x58] sm:$0xff]  ;;  %v1522_v25 = vld [vmem:[%s3320_s0 + $0x70] sm:$0xff] }
  0x34   :  { %197 = vmatmul.mubr.f32.gmra.mxu0 %v1482_v31  ;;  %310 = vmatmul.mubr.f32.gmra.mxu1 %v35_v32  ;;  %v1562_v26 = vld [vmem:[%s3320_s0 + $0x78] sm:$0xff]  ;;  %v1523_v27 = vld [vmem:[%s3320_s0 + $0x90] sm:$0xff] }
  0x35   :  { %394 = vmatprep.subr.mxu0 %v1546_v33  ;;  %564 = vmatpush1.msra.mxu1 %v1587_v34  ;;  %v1563_v28 = vld [vmem:[%s3320_s0 + $0x98] sm:$0xff]  ;;  %v1524_v29 = vld [vmem:[%s3320_s0 + $0xb0] sm:$0xff] }
  0x36   :  { %395 = vmatpush1.msra.mxu0 %v1545_v35  ;;  %565 = vmatprep.subr.mxu1 %v1586_v36  ;;  %v1564_v30 = vld [vmem:[%s3320_s0 + $0xb8] sm:$0xff]  ;;  %v1525_v31 = vld [vmem:[%s3320_s0 + $0xd0] sm:$0xff] }
  0x37   :  { %396 = vmatprep.subr.mxu0 %v1544_v37  ;;  %566 = vmatpush1.msra.mxu1 %v1585_v38  ;;  %v1565_v32 = vld [vmem:[%s3320_s0 + $0xd8] sm:$0xff]  ;;  %v1526_v33 = vld [vmem:[%s3320_s0 + $0xf0] sm:$0xff] }
  0x38   :  { %202 = vmatprep.mubr.f32.mxu0 %v1782_v3  ;;  %315 = vmatprep.mubr.f32.mxu1 %v1782_v3  ;;  %v1566_v34 = vld [vmem:[%s3320_s0 + $0xf8] sm:$0xff]  ;;  %v2372_v38 = vld [vmem:[%s3321_s3 + $0xf0] sm:$0xff] }
  0x39   :  { %397 = vmatpush1.msra.mxu0 %v1543_v39  ;;  %567 = vmatprep.subr.mxu1 %v1584_v40  ;;  %v2348_v35 = vld [vmem:[%s3321_s3 + $0xf8] sm:$0xff]  ;;  %v2377_v39 = vld [vmem:[%s3321_s3 + $0x1f0] sm:$0xff] }
  0x3a   :  { %203 = vmatmul.mubr.f32.gmra.mxu0 %v1483_v41  ;;  %316 = vmatmul.mubr.f32.gmra.mxu1 %v36_v42  ;;  %v2353_v36 = vld [vmem:[%s3321_s3 + $0x1f8] sm:$0xff]  ;;  %v2384_v40 = vld [vmem:[%s3321_s3 + $0x70] sm:$0xff]  ;;  %v2396_v42 = vld [vmem:[%s3321_s3 + $0xe8] sm:$0xff] }
  0x3b   :  { %398 = vmatprep.subr.mxu0 %v1542_v43  ;;  %568 = vmatpush1.msra.mxu1 %v1583_v44  ;;  %v2365_v37 = vld [vmem:[%s3321_s3 + $0x178] sm:$0xff]  ;;  %v2389_v41 = vld [vmem:[%s3321_s3 + $0x170] sm:$0xff]  ;;  %v2401_v43 = vld [vmem:[%s3321_s3 + $0x1e8] sm:$0xff] }
  0x3c   :  { %399 = vmatpush1.msra.mxu0 %v1541_v45  ;;  %569 = vmatprep.subr.mxu1 %v1582_v46  ;;  %v2408_v44 = vld [vmem:[%s3321_s3 + $0x68] sm:$0xff]  ;;  %v2420_v46 = vld [vmem:[%s3321_s3 + $0xe0] sm:$0xff] }
  0x3d   :  { %400 = vmatprep.subr.mxu0 %v1540_v47  ;;  %570 = vmatpush1.msra.mxu1 %v1581_v48  ;;  %v2413_v45 = vld [vmem:[%s3321_s3 + $0x168] sm:$0xff]  ;;  %v2425_v47 = vld [vmem:[%s3321_s3 + $0x1e0] sm:$0xff] }
  0x3e   :  { %208 = vmatprep.mubr.f32.mxu0 %v1782_v3  ;;  %321 = vmatprep.mubr.f32.mxu1 %v1782_v3  ;;  %3380 = vst [vmem:[#allocation2_spill] sm:$0xff] %v2425_v47  ;;  %v2432_v48 = vld [vmem:[%s3321_s3 + $0x60] sm:$0xff] }
  0x3f   :  { %401 = vmatpush1.msra.mxu0 %v1539_v49  ;;  %571 = vmatprep.subr.mxu1 %v1580_v50  ;;  %3381 = vst [vmem:[#allocation3_spill] sm:$0xff] %v2432_v48  ;;  %v2437_v49 = vld [vmem:[%s3321_s3 + $0x160] sm:$0xff]  ;;  %v2444_v50 = vld [vmem:[%s3321_s3 + $0xd8] sm:$0xff] }
  0x40   :  { %209 = vmatmul.mubr.f32.gmra.mxu0 %v1484_v51  ;;  %322 = vmatmul.mubr.f32.gmra.mxu1 %v37_v52  ;;  %3382 = vst [vmem:[#allocation4_spill] sm:$0xff] %v2437_v49  ;;  %3383 = vst [vmem:[#allocation5_spill] sm:$0xff] %v2444_v50  ;;  %v2449_v51 = vld [vmem:[%s3321_s3 + $0x1d8] sm:$0xff] }
  0x41   :  { %402 = vmatprep.subr.mxu0 %v1538_v53  ;;  %572 = vmatpush1.msra.mxu1 %v1579_v54  ;;  %3384 = vst [vmem:[#allocation6_spill] sm:$0xff] %v2449_v51  ;;  %v2456_v52 = vld [vmem:[%s3321_s3 + $0x58] sm:$0xff]  ;;  %v2468_v54 = vld [vmem:[%s3321_s3 + $0xd0] sm:$0xff] }
  0x42   :  { %403 = vmatpush1.msra.mxu0 %v1537_v55  ;;  %573 = vmatprep.subr.mxu1 %v1578_v56  ;;  %3385 = vst [vmem:[#allocation7_spill] sm:$0xff] %v2456_v52  ;;  %v2461_v53 = vld [vmem:[%s3321_s3 + $0x158] sm:$0xff]  ;;  %3387 = vst [vmem:[#allocation9_spill] sm:$0xff] %v2468_v54  ;;  %v2473_v55 = vld [vmem:[%s3321_s3 + $0x1d0] sm:$0xff] }
  0x43   :  { %404 = vmatprep.subr.mxu0 %v1536_v57  ;;  %574 = vmatpush1.msra.mxu1 %v1577_v58  ;;  %3386 = vst [vmem:[#allocation8_spill] sm:$0xff] %v2461_v53  ;;  %3388 = vst [vmem:[#allocation10_spill] sm:$0xff] %v2473_v55  ;;  %v2480_v56 = vld [vmem:[%s3321_s3 + $0x50] sm:$0xff]  ;;  %v2492_v58 = vld [vmem:[%s3321_s3 + $0xc8] sm:$0xff] }
  0x44   :  { %214 = vmatprep.mubr.f32.mxu0 %v1782_v3  ;;  %327 = vmatprep.mubr.f32.mxu1 %v1782_v3  ;;  %3389 = vst [vmem:[#allocation11_spill] sm:$0xff] %v2480_v56  ;;  %v2485_v57 = vld [vmem:[%s3321_s3 + $0x150] sm:$0xff]  ;;  %3391 = vst [vmem:[#allocation13_spill] sm:$0xff] %v2492_v58 }
  0x45   :  { %405 = vmatpush1.msra.mxu0 %v1535_v59  ;;  %575 = vmatprep.subr.mxu1 %v1576_v60  ;;  %3390 = vst [vmem:[#allocation12_spill] sm:$0xff] %v2485_v57  ;;  %v2497_v59 = vld [vmem:[%s3321_s3 + $0x1c8] sm:$0xff] }
  0x46   :  { %215 = vmatmul.mubr.f32.gmra.mxu0 %v1485_v61  ;;  %328 = vmatmul.mubr.f32.gmra.mxu1 %v38_v62  ;;  %3392 = vst [vmem:[#allocation14_spill] sm:$0xff] %v2497_v59  ;;  %v2504_v60 = vld [vmem:[%s3321_s3 + $0x48] sm:$0xff]  ;;  %v2516_v62 = vld [vmem:[%s3321_s3 + $0xc0] sm:$0xff] }
  0x47   :  { %406 = vmatprep.subr.mxu0 %v1534_v63  ;;  %576 = vmatpush1.msra.mxu1 %v1575_v0  ;;  %3393 = vst [vmem:[#allocation15_spill] sm:$0xff] %v2504_v60  ;;  %v2509_v61 = vld [vmem:[%s3321_s3 + $0x148] sm:$0xff]  ;;  %3395 = vst [vmem:[#allocation17_spill] sm:$0xff] %v2516_v62  ;;  %v2521_v63 = vld [vmem:[%s3321_s3 + $0x1c0] sm:$0xff] }
  0x48   :  { %407 = vmatpush1.msra.mxu0 %v1533_v1  ;;  %577 = vmatprep.subr.mxu1 %v1574_v2  ;;  %3394 = vst [vmem:[#allocation16_spill] sm:$0xff] %v2509_v61  ;;  %3396 = vst [vmem:[#allocation18_spill] sm:$0xff] %v2521_v63  ;;  %v2528_v0 = vld [vmem:[%s3321_s3 + $0x40] sm:$0xff]  ;;  %v2540_v2 = vld [vmem:[%s3321_s3 + $0xb8] sm:$0xff] }
  0x49   :  { %408 = vmatprep.subr.mxu0 %v1532_v4  ;;  %578 = vmatpush1.msra.mxu1 %v1573_v5  ;;  %3397 = vst [vmem:[#allocation19_spill] sm:$0xff] %v2528_v0  ;;  %v2533_v1 = vld [vmem:[%s3321_s3 + $0x140] sm:$0xff]  ;;  %3399 = vst [vmem:[#allocation21_spill] sm:$0xff] %v2540_v2  ;;  %v2545_v4 = vld [vmem:[%s3321_s3 + $0x1b8] sm:$0xff] }
  0x4a   :  { %220 = vmatprep.mubr.f32.mxu0 %v1782_v3  ;;  %333 = vmatprep.mubr.f32.mxu1 %v1782_v3  ;;  %3398 = vst [vmem:[#allocation20_spill] sm:$0xff] %v2533_v1  ;;  %3400 = vst [vmem:[#allocation22_spill] sm:$0xff] %v2545_v4  ;;  %v2552_v5 = vld [vmem:[%s3321_s3 + $0x38] sm:$0xff] }
  0x4b   :  { %409 = vmatpush1.msra.mxu0 %v1531_v6  ;;  %579 = vmatprep.subr.mxu1 %v1572_v7  ;;  %3401 = vst [vmem:[#allocation23_spill] sm:$0xff] %v2552_v5  ;;  %v2557_v6 = vld [vmem:[%s3321_s3 + $0x138] sm:$0xff]  ;;  %v2564_v7 = vld [vmem:[%s3321_s3 + $0xb0] sm:$0xff] }
  0x4c   :  { %221 = vmatmul.mubr.f32.gmra.mxu0 %v1486_v8  ;;  %334 = vmatmul.mubr.f32.gmra.mxu1 %v39_v9  ;;  %3402 = vst [vmem:[#allocation24_spill] sm:$0xff] %v2557_v6  ;;  %3403 = vst [vmem:[#allocation25_spill] sm:$0xff] %v2564_v7  ;;  %v2569_v8 = vld [vmem:[%s3321_s3 + $0x1b0] sm:$0xff] }
  0x4d   :  { %410 = vmatprep.subr.mxu0 %v1530_v10  ;;  %580 = vmatpush1.msra.mxu1 %v1571_v11  ;;  %3404 = vst [vmem:[#allocation26_spill] sm:$0xff] %v2569_v8  ;;  %v2576_v9 = vld [vmem:[%s3321_s3 + $0x30] sm:$0xff]  ;;  %v2588_v11 = vld [vmem:[%s3321_s3 + $0xa8] sm:$0xff] }
  0x4e   :  { %411 = vmatpush1.msra.mxu0 %v1529_v12  ;;  %581 = vmatprep.subr.mxu1 %v1570_v13  ;;  %3405 = vst [vmem:[#allocation27_spill] sm:$0xff] %v2576_v9  ;;  %v2581_v10 = vld [vmem:[%s3321_s3 + $0x130] sm:$0xff]  ;;  %3407 = vst [vmem:[#allocation29_spill] sm:$0xff] %v2588_v11  ;;  %v2593_v12 = vld [vmem:[%s3321_s3 + $0x1a8] sm:$0xff] }
  0x4f   :  { %412 = vmatprep.subr.mxu0 %v1528_v14  ;;  %582 = vmatpush1.msra.mxu1 %v1569_v15  ;;  %3406 = vst [vmem:[#allocation28_spill] sm:$0xff] %v2581_v10  ;;  %3408 = vst [vmem:[#allocation30_spill] sm:$0xff] %v2593_v12  ;;  %v2600_v13 = vld [vmem:[%s3321_s3 + $0x28] sm:$0xff]  ;;  %v2612_v15 = vld [vmem:[%s3321_s3 + $0xa0] sm:$0xff] }
  0x50   :  { %413 = vmatpush1.msra.mxu0 %v1527_v16  ;;  %446 = vmatprep.mubr.f32.mxu0 %v1782_v3  ;;  %3409 = vst [vmem:[#allocation31_spill] sm:$0xff] %v2600_v13  ;;  %v2605_v14 = vld [vmem:[%s3321_s3 + $0x128] sm:$0xff]  ;;  %3411 = vst [vmem:[#allocation33_spill] sm:$0xff] %v2612_v15  ;;  %v2617_v16 = vld [vmem:[%s3321_s3 + $0x1a0] sm:$0xff] }
  0x51   :  { %583 = vmatprep.subr.mxu1 %v1568_v17  ;;  %447 = vmatmul.mubr.f32.vlgmr.msra.gmra.mxu0 %v1519_v18  ;;  %3410 = vst [vmem:[#allocation32_spill] sm:$0xff] %v2605_v14  ;;  %3412 = vst [vmem:[#allocation34_spill] sm:$0xff] %v2617_v16  ;;  %v2624_v17 = vld [vmem:[%s3321_s3 + $0x20] sm:$0xff] }
  0x52   :  { %584 = vmatpush1.msra.mxu1 %v1567_v19  ;;  %617 = vmatprep.mubr.f32.mxu1 %v1782_v3  ;;  %3413 = vst [vmem:[#allocation35_spill] sm:$0xff] %v2624_v17  ;;  %v2629_v18 = vld [vmem:[%s3321_s3 + $0x120] sm:$0xff]  ;;  %v2636_v19 = vld [vmem:[%s3321_s3 + $0x98] sm:$0xff] }
  0x53   :  { %452 = vmatprep.mubr.f32.mxu0 %v1782_v3  ;;  %618 = vmatmul.mubr.f32.vlgmr.msra.gmra.mxu1 %v1559_v20  ;;  %3414 = vst [vmem:[#allocation36_spill] sm:$0xff] %v2629_v18  ;;  %3415 = vst [vmem:[#allocation37_spill] sm:$0xff] %v2636_v19  ;;  %v2641_v20 = vld [vmem:[%s3321_s3 + $0x198] sm:$0xff] }
  0x54   :  { %623 = vmatprep.mubr.f32.mxu1 %v1782_v3  ;;  %1602 = vmatprep.subr.mxu0 %v2348_v35  ;;  %3416 = vst [vmem:[#allocation38_spill] sm:$0xff] %v2641_v20 }
  0x55   :  { %453 = vmatmul.mubr.f32.gmra.mxu0 %v1520_v21  ;;  %1637 = vmatprep.subr.mxu1 %v2353_v36  ;;  %v2648_v21 = vld [vmem:[%s3321_s3 + $0x18] sm:$0xff] }
  0x56   :  { %458 = vmatprep.mubr.f32.mxu0 %v1782_v3  ;;  %1638 = vmatpush3.msra.mxu1 %v2365_v37  ;;  %3417 = vst [vmem:[#allocation39_spill] sm:$0xff] %v2648_v21 }
  0x57   :  { %624 = vmatmul.mubr.f32.gmra.mxu1 %v1560_v22  ;;  %1639 = vmatprep.subr.mxu1 %v2377_v39  ;;  %v2653_v22 = vld [vmem:[%s3321_s3 + $0x118] sm:$0xff] }
  0x58   :  { %629 = vmatprep.mubr.f32.mxu1 %v1782_v3  ;;  %1640 = vmatpush3.msra.mxu1 %v2389_v41  ;;  %3418 = vst [vmem:[#allocation40_spill] sm:$0xff] %v2653_v22 }
  0x59   :  { %459 = vmatmul.mubr.f32.gmra.mxu0 %v1521_v23  ;;  %1641 = vmatprep.subr.mxu1 %v2401_v43  ;;  %v2660_v23 = vld [vmem:[%s3321_s3 + $0x90] sm:$0xff] }
  0x5a   :  { %464 = vmatprep.mubr.f32.mxu0 %v1782_v3  ;;  %1642 = vmatpush3.msra.mxu1 %v2413_v45  ;;  %3419 = vst [vmem:[#allocation41_spill] sm:$0xff] %v2660_v23 }
  0x5b   :  { %630 = vmatmul.mubr.f32.gmra.mxu1 %v1561_v24  ;;  %1643 = vmatprep.subr.mxu1 %v2425_v47  ;;  %v2665_v24 = vld [vmem:[%s3321_s3 + $0x190] sm:$0xff] }
  0x5c   :  { %635 = vmatprep.mubr.f32.mxu1 %v1782_v3  ;;  %1644 = vmatpush3.msra.mxu1 %v2437_v49  ;;  %3420 = vst [vmem:[#allocation42_spill] sm:$0xff] %v2665_v24 }
  0x5d   :  { %465 = vmatmul.mubr.f32.gmra.mxu0 %v1522_v25  ;;  %1645 = vmatprep.subr.mxu1 %v2449_v51  ;;  %v2670_v25 = vld [vmem:[%s3321_s3 + $0x10] sm:$0xff] }
  0x5e   :  { %470 = vmatprep.mubr.f32.mxu0 %v1782_v3  ;;  %1646 = vmatpush3.msra.mxu1 %v2461_v53  ;;  %3421 = vst [vmem:[#allocation43_spill] sm:$0xff] %v2670_v25 }
  0x5f   :  { %636 = vmatmul.mubr.f32.gmra.mxu1 %v1562_v26  ;;  %1647 = vmatprep.subr.mxu1 %v2473_v55  ;;  %v2677_v26 = vld [vmem:[%s3321_s3 + $0x110] sm:$0xff] }
  0x60   :  { %641 = vmatprep.mubr.f32.mxu1 %v1782_v3  ;;  %1648 = vmatpush3.msra.mxu1 %v2485_v57  ;;  %3422 = vst [vmem:[#allocation44_spill] sm:$0xff] %v2677_v26 }
  0x61   :  { %471 = vmatmul.mubr.f32.gmra.mxu0 %v1523_v27  ;;  %1649 = vmatprep.subr.mxu1 %v2497_v59  ;;  %v2682_v27 = vld [vmem:[%s3321_s3 + $0x88] sm:$0xff] }
  0x62   :  { %476 = vmatprep.mubr.f32.mxu0 %v1782_v3  ;;  %1650 = vmatpush3.msra.mxu1 %v2509_v61  ;;  %3423 = vst [vmem:[#allocation45_spill] sm:$0xff] %v2682_v27 }
  0x63   :  { %642 = vmatmul.mubr.f32.gmra.mxu1 %v1563_v28  ;;  %1651 = vmatprep.subr.mxu1 %v2521_v63  ;;  %v2687_v28 = vld [vmem:[%s3321_s3 + $0x188] sm:$0xff] }
  0x64   :  { %647 = vmatprep.mubr.f32.mxu1 %v1782_v3  ;;  %1652 = vmatpush3.msra.mxu1 %v2533_v1  ;;  %3424 = vst [vmem:[#allocation46_spill] sm:$0xff] %v2687_v28 }
  0x65   :  { %477 = vmatmul.mubr.f32.gmra.mxu0 %v1524_v29  ;;  %1653 = vmatprep.subr.mxu1 %v2545_v4  ;;  %v2694_v29 = vld [vmem:[%s3321_s3 + $0x8] sm:$0xff] }
  0x66   :  { %482 = vmatprep.mubr.f32.mxu0 %v1782_v3  ;;  %1654 = vmatpush3.msra.mxu1 %v2557_v6  ;;  %3425 = vst [vmem:[#allocation47_spill] sm:$0xff] %v2694_v29 }
  0x67   :  { %648 = vmatmul.mubr.f32.gmra.mxu1 %v1564_v30  ;;  %1655 = vmatprep.subr.mxu1 %v2569_v8  ;;  %v2699_v30 = vld [vmem:[%s3321_s3 + $0x108] sm:$0xff] }
  0x68   :  { %653 = vmatprep.mubr.f32.mxu1 %v1782_v3  ;;  %1656 = vmatpush3.msra.mxu1 %v2581_v10  ;;  %3426 = vst [vmem:[#allocation48_spill] sm:$0xff] %v2699_v30 }
  0x69   :  { %483 = vmatmul.mubr.f32.gmra.mxu0 %v1525_v31  ;;  %1657 = vmatprep.subr.mxu1 %v2593_v12  ;;  %v2704_v31 = vld [vmem:[%s3321_s3 + $0x80] sm:$0xff] }
  0x6a   :  { %488 = vmatprep.mubr.f32.mxu0 %v1782_v3  ;;  %1658 = vmatpush3.msra.mxu1 %v2605_v14  ;;  %3427 = vst [vmem:[#allocation49_spill] sm:$0xff] %v2704_v31 }
  0x6b   :  { %654 = vmatmul.mubr.f32.gmra.mxu1 %v1565_v32  ;;  %1659 = vmatprep.subr.mxu1 %v2617_v16  ;;  %v2711_v32 = vld [vmem:[%s3321_s3 + $0x180] sm:$0xff] }
  0x6c   :  { %659 = vmatprep.mubr.f32.mxu1 %v1782_v3  ;;  %v2360_v3 = vld [vmem:[%s3321_s3 + $0x78] sm:$0xff]  ;;  %1660 = vmatpush3.msra.mxu1 %v2629_v18  ;;  %3428 = vst [vmem:[#allocation50_spill] sm:$0xff] %v2711_v32 }
  0x6d   :  { %489 = vmatmul.mubr.f32.gmra.mxu0 %v1526_v33  ;;  %1661 = vmatprep.subr.mxu1 %v2641_v20  ;;  %v2716_v33 = vld [vmem:[%s3321_s3] sm:$0xff] }
  0x6e   :  { %1603 = vmatpush3.msra.mxu0 %v2360_v3  ;;  %1662 = vmatpush3.msra.mxu1 %v2653_v22  ;;  %3429 = vst [vmem:[#allocation51_spill] sm:$0xff] %v2716_v33 }
  0x6f   :  { %660 = vmatmul.mubr.f32.gmra.mxu1 %v1566_v34  ;;  %1604 = vmatprep.subr.mxu0 %v2372_v38  ;;  %v2721_v34 = vld [vmem:[%s3321_s3 + $0x100] sm:$0xff] }
  0x70   :  { %1605 = vmatpush3.msra.mxu0 %v2384_v40  ;;  %1663 = vmatprep.subr.mxu1 %v2665_v24  ;;  %3430 = vst [vmem:[#allocation52_spill] sm:$0xff] %v2721_v34 }
  0x71   :  { %1606 = vmatprep.subr.mxu0 %v2396_v42  ;;  %1664 = vmatpush3.msra.mxu1 %v2677_v26 }
  0x72   :  { %1607 = vmatpush3.msra.mxu0 %v2408_v44  ;;  %1665 = vmatprep.subr.mxu1 %v2687_v28 }
  0x73   :  { %1608 = vmatprep.subr.mxu0 %v2420_v46  ;;  %1666 = vmatpush3.msra.mxu1 %v2699_v30 }
  0x74   :  { %1609 = vmatpush3.msra.mxu0 %v2432_v48  ;;  %1667 = vmatprep.subr.mxu1 %v2711_v32 }
  0x75   :  { %1610 = vmatprep.subr.mxu0 %v2444_v50  ;;  %1668 = vmatpush3.msra.mxu1 %v2721_v34 }
  0x76   :  { %1611 = vmatpush3.msra.mxu0 %v2456_v52  ;;  %1707 = vmatprep.subr.mxu1 %v2353_v36 }
  0x77   :  { %1612 = vmatprep.subr.mxu0 %v2468_v54 }
  0x78   :  { %1613 = vmatpush3.msra.mxu0 %v2480_v56 }
  0x79   :  { %1614 = vmatprep.subr.mxu0 %v2492_v58 }
  0x7a   :  { %1615 = vmatpush3.msra.mxu0 %v2504_v60 }
  0x7b   :  { %1616 = vmatprep.subr.mxu0 %v2516_v62 }
  0x7c   :  { %1617 = vmatpush3.msra.mxu0 %v2528_v0 }
  0x7d   :  { %1618 = vmatprep.subr.mxu0 %v2540_v2 }
  0x7e   :  { %1619 = vmatpush3.msra.mxu0 %v2552_v5 }
  0x7f   :  { %1620 = vmatprep.subr.mxu0 %v2564_v7 }
  0x80   :  { %1621 = vmatpush3.msra.mxu0 %v2576_v9 }
  0x81   :  { %1622 = vmatprep.subr.mxu0 %v2588_v11 }
  0x82   :  { %1623 = vmatpush3.msra.mxu0 %v2600_v13 }
  0x83   :  { %1624 = vmatprep.subr.mxu0 %v2612_v15 }
  0x84   :  { %1625 = vmatpush3.msra.mxu0 %v2624_v17 }
  0x85   :  { %1626 = vmatprep.subr.mxu0 %v2636_v19 }
  0x86   :  { %1627 = vmatpush3.msra.mxu0 %v2648_v21 }
  0x87   :  { %1628 = vmatprep.subr.mxu0 %v2660_v23 }
  0x88   :  { %1629 = vmatpush3.msra.mxu0 %v2670_v25 }
  0x89   :  { %1630 = vmatprep.subr.mxu0 %v2682_v27 }
  0x8a   :  { %1631 = vmatpush3.msra.mxu0 %v2694_v29 }
  0x8b   :  { %1632 = vmatprep.subr.mxu0 %v2704_v31 }
  0x8c   :  { %1633 = vmatpush3.msra.mxu0 %v2716_v33 }
  0x8d   :  { %1672 = vmatprep.subr.mxu0 %v2348_v35 }
  0xe2   :  { %v180_v28 = vpop.f32.mrf.mxu0 }
  0xe3   :  { %v293_v27 = vpop.f32.mrf.mxu1 }
  0xe4   :  { %v182_v26 = vpop.f32.mrf.mxu0  ;;  %v294_v2 = vadd.f32 %v293_v27, %v180_v28 }
  0xe5   :  { %v295_v25 = vpop.f32.mrf.mxu1 }
  0xe6   :  { %v296_v1 = vadd.f32 %v295_v25, %v182_v26 }
  0xe8   :  { %v186_v24 = vpop.f32.mrf.mxu0  ;;  %v299_v29 = vpop.f32.mrf.mxu1 }
  0xe9   :  { %v300_v58 = vadd.f32 %v299_v29, %v186_v24 }
  0xea   :  { %v188_v23 = vpop.f32.mrf.mxu0  ;;  %v301_v30 = vpop.f32.mrf.mxu1 }
  0xeb   :  { %v302_v57 = vadd.f32 %v301_v30, %v188_v23 }
  0xee   :  { %v192_v22 = vpop.f32.mrf.mxu0  ;;  %v305_v31 = vpop.f32.mrf.mxu1 }
  0xef   :  { %v306_v26 = vadd.f32 %v305_v31, %v192_v22 }
  0xf0   :  { %v194_v21 = vpop.f32.mrf.mxu0  ;;  %v307_v32 = vpop.f32.mrf.mxu1 }
  0xf1   :  { %v308_v47 = vadd.f32 %v307_v32, %v194_v21 }
  0xf4   :  { %v198_v20 = vpop.f32.mrf.mxu0  ;;  %v311_v33 = vpop.f32.mrf.mxu1 }
  0xf6   :  { %v200_v19 = vpop.f32.mrf.mxu0  ;;  %v313_v34 = vpop.f32.mrf.mxu1 }
  0xfa   :  { %v204_v18 = vpop.f32.mrf.mxu0  ;;  %v317_v35 = vpop.f32.mrf.mxu1 }
  0xfb   :  { %v318_v22 = vadd.f32 %v317_v35, %v204_v18 }
  0xfc   :  { %v2731_v17 = vpop.f32.mrf.mxu0  ;;  %v2733_v36 = vpop.f32.mrf.mxu1 }
 0x100   :  { %v2735_v16 = vpop.f32.mrf.mxu0  ;;  %v2737_v15 = vpop.f32.mrf.mxu1 }
 0x101   :  { %v324_v24 = vadd.f32 %v2737_v15, %v2735_v16 }
 0x102   :  { %v2739_v14 = vpop.f32.mrf.mxu0  ;;  %v2741_v13 = vpop.f32.mrf.mxu1 }
 0x103   :  { %v326_v18 = vadd.f32 %v2741_v13, %v2739_v14 }
 0x106   :  { %v2743_v12 = vpop.f32.mrf.mxu0  ;;  %v2745_v11 = vpop.f32.mrf.mxu1 }
 0x107   :  { %v330_v29 = vadd.f32 %v2745_v11, %v2743_v12 }
 0x108   :  { %v2747_v10 = vpop.f32.mrf.mxu0  ;;  %v2749_v9 = vpop.f32.mrf.mxu1 }
 0x10c   :  { %v2751_v8 = vpop.f32.mrf.mxu0  ;;  %v2753_v7 = vpop.f32.mrf.mxu1 }
 0x10d   :  { %v2782_v15 = vadd.f32 %v2753_v7, %v2751_v8 }
 0x10e   :  { %v2755_v6 = vpop.f32.mrf.mxu0  ;;  %v2757_v5 = vpop.f32.mrf.mxu1 }
 0x111   :  { %v448_v4 = vpop.f32.mrf.mxu0 }
 0x112   :  { %v495_v62 = vadd.f32 %v448_v4, %v294_v2 }
 0x113   :  { %v619_v0 = vpop.f32.mrf.mxu1  ;;  %v450_v63 = vpop.f32.mrf.mxu0 }
 0x114   :  { %v496_v61 = vadd.f32 %v450_v63, %v296_v1  ;;  %v666_v53 = vadd.f32 %v619_v0, %v495_v62  ;;  %v2762_v63 = vld [vmem:[%s3322_s2] ss:$0 sm:$0xff] }
 0x115   :  { %v621_v60 = vpop.f32.mrf.mxu1  ;;  %v454_v59 = vpop.f32.mrf.mxu0 }
 0x116   :  { %v667_v56 = vadd.f32 %v621_v60, %v496_v61  ;;  %v497_v51 = vadd.f32 %v454_v59, %v300_v58 }
 0x117   :  { %v625_v55 = vpop.f32.mrf.mxu1  ;;  %v456_v54 = vpop.f32.mrf.mxu0 }
 0x118   :  { %v691_v52 = vrot.slane %v667_v56, 1  ;;  %v498_v50 = vadd.f32 %v456_v54, %v302_v57  ;;  %v668_v60 = vadd.f32 %v625_v55, %v497_v51  ;;  %v312_v54 = vadd.f32 %v311_v33, %v198_v20 }
 0x119   :  { %v627_v49 = vpop.f32.mrf.mxu1  ;;  %v460_v48 = vpop.f32.mrf.mxu0  ;;  %v320_v20 = vadd.f32 %v2733_v36, %v2731_v17  ;;  %v332_v17 = vadd.f32 %v2749_v9, %v2747_v10 }
 0x11a   :  { %v707_v27 = vadd.f32 %v691_v52, %v666_v53  ;;  %v669_v25 = vadd.f32 %v627_v49, %v498_v50  ;;  %v499_v62 = vadd.f32 %v460_v48, %v306_v26  ;;  %v314_v49 = vadd.f32 %v313_v34, %v200_v19 }
 0x11b   :  { %v631_v1 = vpop.f32.mrf.mxu1  ;;  %v462_v2 = vpop.f32.mrf.mxu0 }
 0x11c   :  { %v692_v61 = vrot.slane %v669_v25, 1  ;;  %v500_v4 = vadd.f32 %v462_v2, %v308_v47  ;;  %v721_v57 = vadd.f32 %v2762_v63, %v707_v27  ;;  %v670_v23 = vadd.f32 %v631_v1, %v499_v62 }
 0x11d   :  { %v633_v56 = vpop.f32.mrf.mxu1  ;;  %v466_v58 = vpop.f32.mrf.mxu0  ;;  %v338_v27 = vadd.f32 %v2757_v5, %v2755_v6 }
 0x11e   :  { %v708_v59 = vadd.f32 %v692_v61, %v668_v60  ;;  %v671_v52 = vadd.f32 %v633_v56, %v500_v4  ;;  %v501_v21 = vadd.f32 %v466_v58, %v312_v54  ;;  %v2770_v19 = vmax.f32 %v721_v57, 0.0 }
 0x11f   :  { %v637_v50 = vpop.f32.mrf.mxu1  ;;  %v468_v53 = vpop.f32.mrf.mxu0 }
 0x120   :  { %v722_v0 = vadd.f32 %v2762_v63, %v708_v59  ;;  %v693_v51 = vrot.slane %v671_v52, 1  ;;  %v502_v55 = vadd.f32 %v468_v53, %v314_v49  ;;  %v672_v16 = vadd.f32 %v637_v50, %v501_v21 }
 0x121   :  { %v639_v47 = vpop.f32.mrf.mxu1  ;;  %v472_v48 = vpop.f32.mrf.mxu0  ;;  %v832_v25 = vrot.slane %v2770_v19, 1  ;;  %v862_v9 = vrot.slane %v2770_v19, 3  ;;  %v847_v61 = vrot.slane %v2770_v19, 2 }
 0x122   :  { %v2772_v28 = vmax.f32 %v722_v0, 0.0  ;;  %v709_v30 = vadd.f32 %v693_v51, %v670_v23  ;;  %v673_v31 = vadd.f32 %v639_v47, %v502_v55  ;;  %v503_v34 = vadd.f32 %v472_v48, %v318_v22 }
 0x123   :  { %v643_v32 = vpop.f32.mrf.mxu1  ;;  %v474_v33 = vpop.f32.mrf.mxu0 }
 0x124   :  { %v863_v35 = vrot.slane %v2772_v28, 2  ;;  %v723_v13 = vadd.f32 %v2762_v63, %v709_v30  ;;  %v694_v14 = vrot.slane %v673_v31, 1  ;;  %v504_v36 = vadd.f32 %v474_v33, %v320_v20 }
 0x125   :  { %v645_v11 = vpop.f32.mrf.mxu1  ;;  %v478_v12 = vpop.f32.mrf.mxu0  ;;  %v848_v7 = vrot.slane %v2772_v28, 1  ;;  %v810_v8 = vrot.slane %v2772_v28, 7  ;;  %v674_v4 = vadd.f32 %v643_v32, %v503_v34  ;;  %v833_v57 = vsel %vm811_vm0, %v2772_v28, %v832_v25 }
 0x126   :  { %v2792_v10 = vmax.f32 %v723_v13, 0.0  ;;  %v710_v26 = vadd.f32 %v694_v14, %v672_v16  ;;  %v675_v1 = vadd.f32 %v645_v11, %v504_v36  ;;  %v505_v62 = vadd.f32 %v478_v12, %v324_v24 }
 0x127   :  { %v649_v2 = vpop.f32.mrf.mxu1  ;;  %v480_v60 = vpop.f32.mrf.mxu0  ;;  %v864_v59 = vsel %vm811_vm0, %v863_v35, %v862_v9  ;;  %v849_v53 = vsel %vm811_vm0, %v848_v7, %v847_v61  ;;  %v812_v55 = vsel %vm811_vm0, %v810_v8, %v2770_v19  ;;  %v1030_v24 = vsel %vm817_vm1, %v2772_v28, %v832_v25 }
 0x128   :  { %v506_v56 = vadd.f32 %v480_v60, %v326_v18  ;;  %v724_v5 = vadd.f32 %v2762_v63, %v710_v26  ;;  %v695_v6 = vrot.slane %v675_v1, 1  ;;  %v834_v49 = vrot.slane %v2792_v10, 7 }
 0x129   :  { %v651_v58 = vpop.f32.mrf.mxu1  ;;  %v484_v54 = vpop.f32.mrf.mxu0  ;;  %v865_v50 = vrot.slane %v2792_v10, 1  ;;  %v676_v47 = vadd.f32 %v649_v2, %v505_v62  ;;  %v813_v18 = vrot.slane %v2792_v10, 6  ;;  %v850_v32 = vsel %vm814_vm2, %v2792_v10, %v849_v53 }
 0x12a   :  { %v677_v52 = vadd.f32 %v651_v58, %v506_v56  ;;  %v2806_v0 = vmax.f32 %v724_v5, 0.0  ;;  %v711_v21 = vadd.f32 %v695_v6, %v674_v4  ;;  %v507_v22 = vadd.f32 %v484_v54, %v330_v29 }
 0x12b   :  { %v655_v23 = vpop.f32.mrf.mxu1  ;;  %v486_v51 = vpop.f32.mrf.mxu0  ;;  %v1042_v33 = vsel %vm817_vm1, %v863_v35, %v862_v9  ;;  %v835_v13 = vsel %vm814_vm2, %v834_v49, %v833_v57  ;;  %v815_v5 = vsel %vm814_vm2, %v813_v18, %v812_v55 }
 0x12c   :  { %v696_v48 = vrot.slane %v677_v52, 1  ;;  %v508_v20 = vadd.f32 %v486_v51, %v332_v17  ;;  %v725_v30 = vadd.f32 %v2762_v63, %v711_v21  ;;  %v866_v17 = vsel %vm814_vm2, %v865_v50, %v864_v59 }
 0x12d   :  { %v657_v31 = vpop.f32.mrf.mxu1  ;;  %v490_v29 = vpop.f32.mrf.mxu0  ;;  %v816_v14 = vrot.slane %v2806_v0, 5  ;;  %v678_v11 = vadd.f32 %v655_v23, %v507_v22  ;;  %v836_v26 = vrot.slane %v2806_v0, 6  ;;  %v851_v60 = vrot.slane %v2806_v0, 7 }
 0x12e   :  { %v712_v16 = vadd.f32 %v696_v48, %v676_v47  ;;  %v679_v34 = vadd.f32 %v657_v31, %v508_v20  ;;  %v2824_v36 = vmax.f32 %v725_v30, 0.0  ;;  %v509_v1 = vadd.f32 %v490_v29, %v2782_v15 }
 0x12f   :  { %v661_v12 = vpop.f32.mrf.mxu1  ;;  %v492_v25 = vpop.f32.mrf.mxu0  ;;  %v867_v56 = vsel %vm817_vm1, %v2806_v0, %v866_v17  ;;  %v837_v59 = vsel %vm817_vm1, %v836_v26, %v835_v13  ;;  %v818_v52 = vsel %vm817_vm1, %v816_v14, %v815_v5  ;;  %v852_v47 = vsel %vm817_vm1, %v851_v60, %v850_v32 }
 0x130   :  { %v726_v35 = vadd.f32 %v2762_v63, %v712_v16  ;;  %v697_v9 = vrot.slane %v679_v34, 1  ;;  %v510_v2 = vadd.f32 %v492_v25, %v338_v27  ;;  %v838_v62 = vrot.slane %v2824_v36, 5 }
 0x131   :  { %v663_v4 = vpop.f32.mrf.mxu1  ;;  %v868_v15 = vrot.slane %v2824_v36, 7  ;;  %v819_v27 = vrot.slane %v2824_v36, 4  ;;  %v853_v57 = vrot.slane %v2824_v36, 6  ;;  %v680_v22 = vadd.f32 %v661_v12, %v509_v1 }
 0x132   :  { %v2836_v6 = vmax.f32 %v726_v35, 0.0  ;;  %v713_v58 = vadd.f32 %v697_v9, %v678_v11  ;;  %v681_v54 = vadd.f32 %v663_v4, %v510_v2  ;;  %v839_v55 = vsel %vm820_vm3, %v838_v62, %v837_v59 }
 0x133   :  { %v1031_v48 = vsel %vm820_vm3, %v834_v49, %v1030_v24  ;;  %v869_v29 = vsel %vm820_vm3, %v868_v15, %v867_v56  ;;  %v821_v34 = vsel %vm820_vm3, %v819_v27, %v818_v52  ;;  %v854_v13 = vsel %vm820_vm3, %v853_v57, %v852_v47 }
 0x134   :  { %v822_v53 = vrot.slane %v2836_v6, 3  ;;  %v727_v21 = vadd.f32 %v2762_v63, %v713_v58  ;;  %v698_v23 = vrot.slane %v681_v54, 1  ;;  %v855_v51 = vrot.slane %v2836_v6, 5 }
 0x135   :  { %v840_v31 = vrot.slane %v2836_v6, 4  ;;  %v870_v16 = vrot.slane %v2836_v6, 6  ;;  %v1043_v49 = vsel %vm820_vm3, %v865_v50, %v1042_v33  ;;  %v1032_v11 = vsel %vm823_vm4, %v836_v26, %v1031_v48  ;;  %v3479_v6 = vld [vmem:[#allocation50_spill] sm:$0xff] }
 0x136   :  { %v2853_v20 = vmax.f32 %v727_v21, 0.0  ;;  %v714_v30 = vadd.f32 %v698_v23, %v680_v22  ;;  %v824_v17 = vsel %vm823_vm4, %v822_v53, %v821_v34  ;;  %v856_v35 = vsel %vm823_vm4, %v855_v51, %v854_v13 }
 0x137   :  { %v1033_v9 = vsel %vm826_vm5, %v838_v62, %v1032_v11  ;;  %v1044_v1 = vsel %vm823_vm4, %v2806_v0, %v1043_v49  ;;  %v871_v2 = vsel %vm823_vm4, %v870_v16, %v869_v29  ;;  %v3445_v11 = vld [vmem:[#allocation16_spill] sm:$0xff] }
 0x138   :  { %v728_v24 = vadd.f32 %v2762_v63, %v714_v30  ;;  %v842_v32 = vrot.slane %v2853_v20, 3  ;;  %v872_v12 = vrot.slane %v2853_v20, 5  ;;  %v825_v25 = vrot.slane %v2853_v20, 2 }
 0x139   :  { %v857_v50 = vrot.slane %v2853_v20, 4  ;;  %v841_v63 = vsel %vm823_vm4, %v840_v31, %v839_v55  ;;  %v1034_v4 = vsel %vm829_vm6, %v840_v31, %v1033_v9  ;;  %v1045_v56 = vsel %vm826_vm5, %v868_v15, %v1044_v1  ;;  %v3449_v9 = vld [vmem:[#allocation20_spill] sm:$0xff]  ;;  %v3450_v1 = vld [vmem:[#allocation21_spill] sm:$0xff] }
 0x13a   :  { %v2879_v33 = vmax.f32 %v728_v24, 0.0  ;;  %v843_v26 = vsel %vm826_vm5, %v842_v32, %v841_v63  ;;  %v873_v62 = vsel %vm826_vm5, %v872_v12, %v871_v2  ;;  %v827_v52 = vsel %vm826_vm5, %v825_v25, %v824_v17  ;;  %v3442_v24 = vld [vmem:[#allocation13_spill] sm:$0xff]  ;;  %v3444_v17 = vld [vmem:[#allocation15_spill] sm:$0xff] }
 0x13b   :  { %v858_v21 = vsel %vm826_vm5, %v857_v50, %v856_v35  ;;  %v1046_v15 = vsel %vm829_vm6, %v870_v16, %v1045_v56  ;;  %v1052_v31 = vrot.slane %v1034_v4, 2  ;;  %v3447_v35 = vld [vmem:[#allocation18_spill] sm:$0xff]  ;;  %v3448_v63 = vld [vmem:[#allocation19_spill] sm:$0xff]  ;;  %v3453_v4 = vld [vmem:[#allocation24_spill] sm:$0xff] }
 0x13c   :  { %v844_v5 = vrot.slane %v2879_v33, 2  ;;  %v874_v58 = vrot.slane %v2879_v33, 4  ;;  %v828_v54 = vrot.slane %v2879_v33, 1  ;;  %v859_v59 = vrot.slane %v2879_v33, 3  ;;  %v3452_v2 = vld [vmem:[#allocation23_spill] sm:$0xff]  ;;  %v3454_v56 = vld [vmem:[#allocation25_spill] sm:$0xff] }
 0x13d   :  { %v1058_v16 = vrot.slane %v1046_v15, 2  ;;  %v1036_v15 = vsel %vm817_vm1, %v848_v7, %v847_v61  ;;  %v3465_v7 = vld [vmem:[#allocation36_spill] sm:$0xff]  ;;  %v3472_v33 = vld [vmem:[#allocation43_spill] sm:$0xff] }
 0x13e   :  { %v845_v22 = vsel %vm829_vm6, %v844_v5, %v843_v26  ;;  %v875_v23 = vsel %vm829_vm6, %v874_v58, %v873_v62  ;;  %v830_v55 = vsel %vm829_vm6, %v828_v54, %v827_v52  ;;  %v860_v47 = vsel %vm829_vm6, %v859_v59, %v858_v21  ;;  %v3451_v26 = vld [vmem:[#allocation22_spill] sm:$0xff]  ;;  %v3457_v62 = vld [vmem:[#allocation28_spill] sm:$0xff]  ;;  %v3458_v52 = vld [vmem:[#allocation29_spill] sm:$0xff] }
 0x13f   :  { %947 = vmatprep.mubr.f32.mxu0 %v845_v22  ;;  %1017 = vmatprep.mubr.f32.mxu1 %v875_v23  ;;  %v1035_v48 = vsel %vm811_vm0, %v844_v5, %v842_v32  ;;  %v1047_v30 = vsel %vm811_vm0, %v874_v58, %v872_v12  ;;  %v3443_v32 = vld [vmem:[#allocation14_spill] sm:$0xff]  ;;  %v3446_v12 = vld [vmem:[#allocation17_spill] sm:$0xff]  ;;  %v3456_v58 = vld [vmem:[#allocation27_spill] sm:$0xff]  ;;  %v1037_v28 = vsel %vm820_vm3, %v2792_v10, %v1036_v15 }
 0x140   :  { %948 = vmatmul.mubr.f32.vlgmr.msra.gmra.mxu0 %v830_v55  ;;  %1018 = vmatmul.mubr.f32.vlgmr.msra.gmra.mxu1 %v860_v47  ;;  %v1053_v29 = vrot.slane %v1035_v48, 2  ;;  %v1059_v34 = vrot.slane %v1047_v30, 2  ;;  %v3455_v5 = vld [vmem:[#allocation26_spill] sm:$0xff]  ;;  %v3460_v22 = vld [vmem:[#allocation31_spill] sm:$0xff]  ;;  %v3461_v23 = vld [vmem:[#allocation32_spill] sm:$0xff]  ;;  %v1024_v55 = vsel %vm817_vm1, %v810_v8, %v2770_v19  ;;  %v1041_v10 = vsel %vm811_vm0, %v859_v59, %v857_v50 }
 0x141   :  { %1673 = vmatpush3.msra.mxu0 %v2360_v3  ;;  %1708 = vmatpush3.msra.mxu1 %v2365_v37  ;;  %v3431_v3 = vld [vmem:[#allocation2_spill] sm:$0xff]  ;;  %v3432_v37 = vld [vmem:[#allocation3_spill] sm:$0xff]  ;;  %v3462_v47 = vld [vmem:[#allocation33_spill] sm:$0xff]  ;;  %v1025_v30 = vsel %vm820_vm3, %v813_v18, %v1024_v55  ;;  %v1029_v18 = vsel %vm811_vm0, %v828_v54, %v825_v25  ;;  %v1056_v36 = vrot.slane %v1041_v10, 2 }
 0x142   :  { %1674 = vmatprep.subr.mxu0 %v2372_v38  ;;  %1709 = vmatprep.subr.mxu1 %v2377_v39  ;;  %v1054_v13 = vsel %vm1048_vm7, %v1052_v31, %v1053_v29  ;;  %v1060_v49 = vsel %vm1048_vm7, %v1058_v16, %v1059_v34  ;;  %v3433_v38 = vld [vmem:[#allocation4_spill] sm:$0xff]  ;;  %v3434_v39 = vld [vmem:[#allocation5_spill] sm:$0xff]  ;;  %v3459_v21 = vld [vmem:[#allocation30_spill] sm:$0xff]  ;;  %v1026_v61 = vsel %vm823_vm4, %v816_v14, %v1025_v30 }
 0x143   :  { %1675 = vmatpush3.msra.mxu0 %v2384_v40  ;;  %1129 = vmatprep.mubr.f32.mxu0 %v1054_v13  ;;  %v3435_v40 = vld [vmem:[#allocation6_spill] sm:$0xff]  ;;  %v3464_v31 = vld [vmem:[#allocation35_spill] sm:$0xff]  ;;  %v3466_v19 = vld [vmem:[#allocation37_spill] sm:$0xff]  ;;  %v1038_v29 = vsel %vm823_vm4, %v851_v60, %v1037_v28  ;;  %v1027_v34 = vsel %vm826_vm5, %v819_v27, %v1026_v61  ;;  %v1050_v27 = vrot.slane %v1029_v18, 2 }
 0x144   :  { %1710 = vmatpush3.msra.mxu1 %v2389_v41  ;;  %1199 = vmatprep.mubr.f32.mxu1 %v1060_v49  ;;  %v3436_v41 = vld [vmem:[#allocation7_spill] sm:$0xff]  ;;  %v3463_v48 = vld [vmem:[#allocation34_spill] sm:$0xff]  ;;  %v3469_v16 = vld [vmem:[#allocation40_spill] sm:$0xff]  ;;  %v1039_v0 = vsel %vm826_vm5, %v853_v57, %v1038_v29  ;;  %v1028_v20 = vsel %vm829_vm6, %v822_v53, %v1027_v34 }
 0x145   :  { %1676 = vmatprep.subr.mxu0 %v2396_v42  ;;  %1711 = vmatprep.subr.mxu1 %v2401_v43  ;;  %v3437_v42 = vld [vmem:[#allocation8_spill] sm:$0xff]  ;;  %v3438_v43 = vld [vmem:[#allocation9_spill] sm:$0xff]  ;;  %v3467_v8 = vld [vmem:[#allocation38_spill] sm:$0xff]  ;;  %v1040_v50 = vsel %vm829_vm6, %v855_v51, %v1039_v0 }
 0x146   :  { %1677 = vmatpush3.msra.mxu0 %v2408_v44  ;;  %1712 = vmatpush3.msra.mxu1 %v2413_v45  ;;  %v3439_v44 = vld [vmem:[#allocation10_spill] sm:$0xff]  ;;  %v3440_v45 = vld [vmem:[#allocation11_spill] sm:$0xff]  ;;  %v3470_v25 = vld [vmem:[#allocation41_spill] sm:$0xff]  ;;  %v1055_v53 = vrot.slane %v1040_v50, 2 }
 0x147   :  { %1678 = vmatprep.subr.mxu0 %v2420_v46  ;;  %1713 = vmatprep.subr.mxu1 %v3431_v3  ;;  %v3441_v46 = vld [vmem:[#allocation12_spill] sm:$0xff]  ;;  %v3468_v14 = vld [vmem:[#allocation39_spill] sm:$0xff]  ;;  %v3471_v60 = vld [vmem:[#allocation42_spill] sm:$0xff]  ;;  %v1049_v3 = vrot.slane %v1028_v20, 2 }
 0x148   :  { %1679 = vmatpush3.msra.mxu0 %v3432_v37  ;;  %1714 = vmatpush3.msra.mxu1 %v3433_v38  ;;  %v3473_v54 = vld [vmem:[#allocation44_spill] sm:$0xff]  ;;  %v3474_v59 = vld [vmem:[#allocation45_spill] sm:$0xff]  ;;  %v3475_v57 = vld [vmem:[#allocation46_spill] sm:$0xff] }
 0x149   :  { %1680 = vmatprep.subr.mxu0 %v3434_v39  ;;  %1715 = vmatprep.subr.mxu1 %v3435_v40  ;;  %v3476_v13 = vld [vmem:[#allocation47_spill] sm:$0xff]  ;;  %v3477_v49 = vld [vmem:[#allocation48_spill] sm:$0xff]  ;;  %v3478_v37 = vld [vmem:[#allocation49_spill] sm:$0xff]  ;;  %v1051_v40 = vsel %vm1048_vm7, %v1049_v3, %v1050_v27 }
 0x14a   :  { %1681 = vmatpush3.msra.mxu0 %v3436_v41  ;;  %1716 = vmatpush3.msra.mxu1 %v3437_v42  ;;  %v1237_v51 = vld [vmem:[%s3323_s5 + $0xf8] sm:$0xff]  ;;  %v3480_v38 = vld [vmem:[#allocation51_spill] sm:$0xff]  ;;  %v3481_v39 = vld [vmem:[#allocation52_spill] sm:$0xff]  ;;  %v1057_v41 = vsel %vm1048_vm7, %v1055_v53, %v1056_v36 }
 0x14b   :  { %1682 = vmatprep.subr.mxu0 %v3438_v43  ;;  %1717 = vmatprep.subr.mxu1 %v3439_v44  ;;  %v1236_v42 = vld [vmem:[%s3323_s5 + $0xf0] sm:$0xff]  ;;  %v1235_v43 = vld [vmem:[%s3323_s5 + $0xe8] sm:$0xff]  ;;  %v1234_v44 = vld [vmem:[%s3323_s5 + $0xe0] sm:$0xff] }
 0x14c   :  { %1683 = vmatpush3.msra.mxu0 %v3440_v45  ;;  %1718 = vmatpush3.msra.mxu1 %v3441_v46  ;;  %v1233_v45 = vld [vmem:[%s3323_s5 + $0xd8] sm:$0xff]  ;;  %v1232_v46 = vld [vmem:[%s3323_s5 + $0xd0] sm:$0xff]  ;;  %v1210_v55 = vld [vmem:[%s3323_s5 + $0x20] sm:$0xff] }
 0x14d   :  { %1684 = vmatprep.subr.mxu0 %v3442_v24  ;;  %1719 = vmatprep.subr.mxu1 %v3443_v32  ;;  %v1231_v24 = vld [vmem:[%s3323_s5 + $0xc8] sm:$0xff]  ;;  %v1230_v32 = vld [vmem:[%s3323_s5 + $0xc0] sm:$0xff]  ;;  %v1213_v15 = vld [vmem:[%s3323_s5 + $0x38] sm:$0xff] }
 0x14e   :  { %1685 = vmatpush3.msra.mxu0 %v3444_v17  ;;  %1720 = vmatpush3.msra.mxu1 %v3445_v11  ;;  %v1229_v17 = vld [vmem:[%s3323_s5 + $0xb8] sm:$0xff]  ;;  %v1228_v11 = vld [vmem:[%s3323_s5 + $0xb0] sm:$0xff]  ;;  %v1207_v30 = vld [vmem:[%s3323_s5 + $0x8] sm:$0xff] }
 0x14f   :  { %1686 = vmatprep.subr.mxu0 %v3446_v12  ;;  %1721 = vmatprep.subr.mxu1 %v3447_v35  ;;  %v1227_v12 = vld [vmem:[%s3323_s5 + $0xa8] sm:$0xff]  ;;  %v1226_v35 = vld [vmem:[%s3323_s5 + $0xa0] sm:$0xff]  ;;  %v1268_v61 = vld [vmem:[%s3323_s5 + $0x1f0] sm:$0xff] }
 0x150   :  { %1687 = vmatpush3.msra.mxu0 %v3448_v63  ;;  %1722 = vmatpush3.msra.mxu1 %v3449_v9  ;;  %v1225_v63 = vld [vmem:[%s3323_s5 + $0x98] sm:$0xff]  ;;  %v1224_v9 = vld [vmem:[%s3323_s5 + $0x90] sm:$0xff]  ;;  %v1267_v28 = vld [vmem:[%s3323_s5 + $0x1e8] sm:$0xff] }
 0x151   :  { %1688 = vmatprep.subr.mxu0 %v3450_v1  ;;  %1723 = vmatprep.subr.mxu1 %v3451_v26  ;;  %v1223_v1 = vld [vmem:[%s3323_s5 + $0x88] sm:$0xff]  ;;  %v1222_v26 = vld [vmem:[%s3323_s5 + $0x80] sm:$0xff]  ;;  %v1264_v18 = vld [vmem:[%s3323_s5 + $0x1d0] sm:$0xff] }
 0x152   :  { %1689 = vmatpush3.msra.mxu0 %v3452_v2  ;;  %1724 = vmatpush3.msra.mxu1 %v3453_v4  ;;  %v1221_v2 = vld [vmem:[%s3323_s5 + $0x78] sm:$0xff]  ;;  %v1220_v4 = vld [vmem:[%s3323_s5 + $0x70] sm:$0xff]  ;;  %v1263_v29 = vld [vmem:[%s3323_s5 + $0x1c8] sm:$0xff] }
 0x153   :  { %1690 = vmatprep.subr.mxu0 %v3454_v56  ;;  %1725 = vmatprep.subr.mxu1 %v3455_v5  ;;  %v1219_v56 = vld [vmem:[%s3323_s5 + $0x68] sm:$0xff]  ;;  %v1218_v5 = vld [vmem:[%s3323_s5 + $0x60] sm:$0xff]  ;;  %v1245_v3 = vld [vmem:[%s3323_s5 + $0x138] sm:$0xff] }
 0x154   :  { %1691 = vmatpush3.msra.mxu0 %v3456_v58  ;;  %1726 = vmatpush3.msra.mxu1 %v3457_v62  ;;  %v1217_v58 = vld [vmem:[%s3323_s5 + $0x58] sm:$0xff]  ;;  %v1216_v62 = vld [vmem:[%s3323_s5 + $0x50] sm:$0xff]  ;;  %v1262_v10 = vld [vmem:[%s3323_s5 + $0x1c0] sm:$0xff] }
 0x155   :  { %1692 = vmatprep.subr.mxu0 %v3458_v52  ;;  %1727 = vmatprep.subr.mxu1 %v3459_v21  ;;  %v1215_v52 = vld [vmem:[%s3323_s5 + $0x48] sm:$0xff]  ;;  %v1214_v21 = vld [vmem:[%s3323_s5 + $0x40] sm:$0xff]  ;;  %v1244_v53 = vld [vmem:[%s3323_s5 + $0x130] sm:$0xff] }
 0x156   :  { %1693 = vmatpush3.msra.mxu0 %v3460_v22  ;;  %1728 = vmatpush3.msra.mxu1 %v3461_v23  ;;  %v1212_v22 = vld [vmem:[%s3323_s5 + $0x30] sm:$0xff]  ;;  %v1211_v23 = vld [vmem:[%s3323_s5 + $0x28] sm:$0xff]  ;;  %v1258_v0 = vld [vmem:[%s3323_s5 + $0x1a0] sm:$0xff] }
 0x157   :  { %1694 = vmatprep.subr.mxu0 %v3462_v47  ;;  %1729 = vmatprep.subr.mxu1 %v3463_v48  ;;  %v1209_v47 = vld [vmem:[%s3323_s5 + $0x18] sm:$0xff]  ;;  %v1208_v48 = vld [vmem:[%s3323_s5 + $0x10] sm:$0xff]  ;;  %v1259_v34 = vld [vmem:[%s3323_s5 + $0x1a8] sm:$0xff] }
 0x158   :  { %1695 = vmatpush3.msra.mxu0 %v3464_v31  ;;  %1730 = vmatpush3.msra.mxu1 %v3465_v7  ;;  %v1206_v31 = vld [vmem:[%s3323_s5] sm:$0xff]  ;;  %v1269_v7 = vld [vmem:[%s3323_s5 + $0x1f8] sm:$0xff]  ;;  %v1255_v20 = vld [vmem:[%s3323_s5 + $0x188] sm:$0xff] }
 0x159   :  { %1696 = vmatprep.subr.mxu0 %v3466_v19  ;;  %1731 = vmatprep.subr.mxu1 %v3467_v8  ;;  %v1266_v19 = vld [vmem:[%s3323_s5 + $0x1e0] sm:$0xff]  ;;  %v1265_v8 = vld [vmem:[%s3323_s5 + $0x1d8] sm:$0xff]  ;;  %v1251_v27 = vld [vmem:[%s3323_s5 + $0x168] sm:$0xff] }
 0x15a   :  { %1697 = vmatpush3.msra.mxu0 %v3468_v14  ;;  %1732 = vmatpush3.msra.mxu1 %v3469_v16  ;;  %v1261_v14 = vld [vmem:[%s3323_s5 + $0x1b8] sm:$0xff]  ;;  %v1260_v16 = vld [vmem:[%s3323_s5 + $0x1b0] sm:$0xff]  ;;  %v1254_v50 = vld [vmem:[%s3323_s5 + $0x180] sm:$0xff] }
 0x15b   :  { %1698 = vmatprep.subr.mxu0 %v3470_v25  ;;  %1733 = vmatprep.subr.mxu1 %v3471_v60  ;;  %v1257_v25 = vld [vmem:[%s3323_s5 + $0x198] sm:$0xff]  ;;  %v1256_v60 = vld [vmem:[%s3323_s5 + $0x190] sm:$0xff]  ;;  %v1250_v36 = vld [vmem:[%s3323_s5 + $0x160] sm:$0xff] }
 0x15c   :  { %1699 = vmatpush3.msra.mxu0 %v3472_v33  ;;  %1734 = vmatpush3.msra.mxu1 %v3473_v54  ;;  %v1253_v33 = vld [vmem:[%s3323_s5 + $0x178] sm:$0xff]  ;;  %v1252_v54 = vld [vmem:[%s3323_s5 + $0x170] sm:$0xff] }
 0x15d   :  { %1700 = vmatprep.subr.mxu0 %v3474_v59  ;;  %1735 = vmatprep.subr.mxu1 %v3475_v57  ;;  %v1249_v59 = vld [vmem:[%s3323_s5 + $0x158] sm:$0xff]  ;;  %v1248_v57 = vld [vmem:[%s3323_s5 + $0x150] sm:$0xff] }
 0x15e   :  { %1701 = vmatpush3.msra.mxu0 %v3476_v13  ;;  %1736 = vmatpush3.msra.mxu1 %v3477_v49  ;;  %v1247_v13 = vld [vmem:[%s3323_s5 + $0x148] sm:$0xff]  ;;  %v1246_v49 = vld [vmem:[%s3323_s5 + $0x140] sm:$0xff] }
 0x15f   :  { %1702 = vmatprep.subr.mxu0 %v3478_v37  ;;  %1737 = vmatprep.subr.mxu1 %v3479_v6  ;;  %v1243_v37 = vld [vmem:[%s3323_s5 + $0x128] sm:$0xff]  ;;  %v1242_v6 = vld [vmem:[%s3323_s5 + $0x120] sm:$0xff] }
 0x160   :  { %1703 = vmatpush3.msra.mxu0 %v3480_v38  ;;  %1738 = vmatpush3.msra.mxu1 %v3481_v39  ;;  %v1386_v38 = vld [vmem:[%s3324_s7 + $0xf8] sm:$0xff] }
 0x161   :  { %1130 = vmatmul.mubr.f32.vlgmr.msra.gmra.mxu0 %v1051_v40  ;;  %1200 = vmatmul.mubr.f32.vlgmr.msra.gmra.mxu1 %v1057_v41  ;;  %v1370_v39 = vld [vmem:[%s3324_s7 + $0x78] sm:$0xff]  ;;  %v1385_v40 = vld [vmem:[%s3324_s7 + $0xf0] sm:$0xff] }
 0x162   :  { %1282 = vmatprep.subr.mxu0 %v1237_v51  ;;  %v1241_v51 = vld [vmem:[%s3323_s5 + $0x118] sm:$0xff]  ;;  %v1240_v41 = vld [vmem:[%s3323_s5 + $0x110] sm:$0xff]  ;;  %1742 = vmatprep.subr.mxu1 %v1386_v38 }
 0x163   :  { %1283 = vmatpush1.msra.mxu0 %v1236_v42  ;;  %v1369_v42 = vld [vmem:[%s3324_s7 + $0x70] sm:$0xff]  ;;  %1743 = vmatpush3.msra.mxu1 %v1370_v39 }
 0x164   :  { %1284 = vmatprep.subr.mxu0 %v1235_v43  ;;  %v1239_v43 = vld [vmem:[%s3323_s5 + $0x108] sm:$0xff]  ;;  %1744 = vmatprep.subr.mxu1 %v1385_v40 }
 0x165   :  { %1285 = vmatpush1.msra.mxu0 %v1234_v44  ;;  %v1384_v44 = vld [vmem:[%s3324_s7 + $0xe8] sm:$0xff]  ;;  %1745 = vmatpush3.msra.mxu1 %v1369_v42  ;;  %v1601_v42 = vld [vmem:[%s3327_s8] ss:$0 sm:$0xff] }
 0x166   :  { %1286 = vmatprep.subr.mxu0 %v1233_v45  ;;  %v1238_v45 = vld [vmem:[%s3323_s5 + $0x100] sm:$0xff]  ;;  %1746 = vmatprep.subr.mxu1 %v1384_v44 }
 0x167   :  { %1287 = vmatpush1.msra.mxu0 %v1232_v46  ;;  %v1368_v46 = vld [vmem:[%s3324_s7 + $0x68] sm:$0xff] }
 0x168   :  { %1288 = vmatprep.subr.mxu0 %v1231_v24  ;;  %v1383_v24 = vld [vmem:[%s3324_s7 + $0xe0] sm:$0xff]  ;;  %1747 = vmatpush3.msra.mxu1 %v1368_v46 }
 0x169   :  { %1289 = vmatpush1.msra.mxu0 %v1230_v32  ;;  %v1367_v32 = vld [vmem:[%s3324_s7 + $0x60] sm:$0xff]  ;;  %1748 = vmatprep.subr.mxu1 %v1383_v24 }
 0x16a   :  { %1290 = vmatprep.subr.mxu0 %v1229_v17  ;;  %v1382_v17 = vld [vmem:[%s3324_s7 + $0xd8] sm:$0xff]  ;;  %1749 = vmatpush3.msra.mxu1 %v1367_v32 }
 0x16b   :  { %1291 = vmatpush1.msra.mxu0 %v1228_v11  ;;  %v1366_v11 = vld [vmem:[%s3324_s7 + $0x58] sm:$0xff]  ;;  %1750 = vmatprep.subr.mxu1 %v1382_v17 }
 0x16c   :  { %1292 = vmatprep.subr.mxu0 %v1227_v12  ;;  %v1381_v12 = vld [vmem:[%s3324_s7 + $0xd0] sm:$0xff]  ;;  %1751 = vmatpush3.msra.mxu1 %v1366_v11 }
 0x16d   :  { %1293 = vmatpush1.msra.mxu0 %v1226_v35  ;;  %v1365_v35 = vld [vmem:[%s3324_s7 + $0x50] sm:$0xff]  ;;  %1752 = vmatprep.subr.mxu1 %v1381_v12 }
 0x16e   :  { %1294 = vmatprep.subr.mxu0 %v1225_v63  ;;  %v1380_v63 = vld [vmem:[%s3324_s7 + $0xc8] sm:$0xff]  ;;  %1753 = vmatpush3.msra.mxu1 %v1365_v35 }
 0x16f   :  { %1295 = vmatpush1.msra.mxu0 %v1224_v9  ;;  %v1364_v9 = vld [vmem:[%s3324_s7 + $0x48] sm:$0xff]  ;;  %1754 = vmatprep.subr.mxu1 %v1380_v63 }
 0x170   :  { %1296 = vmatprep.subr.mxu0 %v1223_v1  ;;  %v1379_v1 = vld [vmem:[%s3324_s7 + $0xc0] sm:$0xff]  ;;  %1755 = vmatpush3.msra.mxu1 %v1364_v9 }
 0x171   :  { %1297 = vmatpush1.msra.mxu0 %v1222_v26  ;;  %v1363_v26 = vld [vmem:[%s3324_s7 + $0x40] sm:$0xff]  ;;  %1756 = vmatprep.subr.mxu1 %v1379_v1 }
 0x172   :  { %1298 = vmatprep.subr.mxu0 %v1221_v2  ;;  %v1378_v2 = vld [vmem:[%s3324_s7 + $0xb8] sm:$0xff]  ;;  %1757 = vmatpush3.msra.mxu1 %v1363_v26 }
 0x173   :  { %1299 = vmatpush1.msra.mxu0 %v1220_v4  ;;  %v1362_v4 = vld [vmem:[%s3324_s7 + $0x38] sm:$0xff]  ;;  %1758 = vmatprep.subr.mxu1 %v1378_v2 }
 0x174   :  { %1300 = vmatprep.subr.mxu0 %v1219_v56  ;;  %v1377_v56 = vld [vmem:[%s3324_s7 + $0xb0] sm:$0xff]  ;;  %1759 = vmatpush3.msra.mxu1 %v1362_v4 }
 0x175   :  { %1301 = vmatpush1.msra.mxu0 %v1218_v5  ;;  %v1361_v5 = vld [vmem:[%s3324_s7 + $0x30] sm:$0xff]  ;;  %1760 = vmatprep.subr.mxu1 %v1377_v56 }
 0x176   :  { %1302 = vmatprep.subr.mxu0 %v1217_v58  ;;  %v1376_v58 = vld [vmem:[%s3324_s7 + $0xa8] sm:$0xff]  ;;  %1761 = vmatpush3.msra.mxu1 %v1361_v5 }
 0x177   :  { %1303 = vmatpush1.msra.mxu0 %v1216_v62  ;;  %v1360_v62 = vld [vmem:[%s3324_s7 + $0x28] sm:$0xff]  ;;  %1762 = vmatprep.subr.mxu1 %v1376_v58 }
 0x178   :  { %1304 = vmatprep.subr.mxu0 %v1215_v52  ;;  %v1375_v52 = vld [vmem:[%s3324_s7 + $0xa0] sm:$0xff]  ;;  %1763 = vmatpush3.msra.mxu1 %v1360_v62 }
 0x179   :  { %1305 = vmatpush1.msra.mxu0 %v1214_v21  ;;  %v1359_v21 = vld [vmem:[%s3324_s7 + $0x20] sm:$0xff]  ;;  %1764 = vmatprep.subr.mxu1 %v1375_v52 }
 0x17a   :  { %1306 = vmatprep.subr.mxu0 %v1213_v15  ;;  %1765 = vmatpush3.msra.mxu1 %v1359_v21 }
 0x17b   :  { %1307 = vmatpush1.msra.mxu0 %v1212_v22 }
 0x17c   :  { %1308 = vmatprep.subr.mxu0 %v1211_v23 }
 0x17d   :  { %1309 = vmatpush1.msra.mxu0 %v1210_v55 }
 0x17e   :  { %1310 = vmatprep.subr.mxu0 %v1209_v47 }
 0x17f   :  { %1311 = vmatpush1.msra.mxu0 %v1208_v48  ;;  %v1600_v48 = vld [vmem:[%s3325_s4] ss:$0 sm:$0xff] }
 0x180   :  { %1312 = vmatprep.subr.mxu0 %v1207_v30 }
 0x181   :  { %1313 = vmatpush1.msra.mxu0 %v1206_v31 }
 0x182   :  { %1314 = vmatprep.subr.mxu0 %v1269_v7 }
 0x183   :  { %1315 = vmatpush2.msra.mxu0 %v1268_v61 }
 0x184   :  { %1316 = vmatprep.subr.mxu0 %v1267_v28 }
 0x185   :  { %1317 = vmatpush2.msra.mxu0 %v1266_v19 }
 0x186   :  { %1318 = vmatprep.subr.mxu0 %v1265_v8 }
 0x187   :  { %1319 = vmatpush2.msra.mxu0 %v1264_v18 }
 0x188   :  { %1320 = vmatprep.subr.mxu0 %v1263_v29 }
 0x189   :  { %1321 = vmatpush2.msra.mxu0 %v1262_v10 }
 0x18a   :  { %1322 = vmatprep.subr.mxu0 %v1261_v14 }
 0x18b   :  { %1323 = vmatpush2.msra.mxu0 %v1260_v16 }
 0x18c   :  { %1324 = vmatprep.subr.mxu0 %v1259_v34 }
 0x18d   :  { %1325 = vmatpush2.msra.mxu0 %v1258_v0  ;;  %v1374_v0 = vld [vmem:[%s3324_s7 + $0x98] sm:$0xff] }
 0x18e   :  { %1326 = vmatprep.subr.mxu0 %v1257_v25  ;;  %v1358_v25 = vld [vmem:[%s3324_s7 + $0x18] sm:$0xff]  ;;  %1766 = vmatprep.subr.mxu1 %v1374_v0 }
 0x18f   :  { %1327 = vmatpush2.msra.mxu0 %v1256_v60  ;;  %1767 = vmatpush3.msra.mxu1 %v1358_v25  ;;  %v1373_v60 = vld [vmem:[%s3324_s7 + $0x90] sm:$0xff] }
 0x190   :  { %1328 = vmatprep.subr.mxu0 %v1255_v20  ;;  %v1357_v20 = vld [vmem:[%s3324_s7 + $0x10] sm:$0xff]  ;;  %1768 = vmatprep.subr.mxu1 %v1373_v60 }
 0x191   :  { %1329 = vmatpush2.msra.mxu0 %v1254_v50  ;;  %v1372_v50 = vld [vmem:[%s3324_s7 + $0x88] sm:$0xff]  ;;  %1769 = vmatpush3.msra.mxu1 %v1357_v20 }
 0x192   :  { %1330 = vmatprep.subr.mxu0 %v1253_v33  ;;  %v1356_v33 = vld [vmem:[%s3324_s7 + $0x8] sm:$0xff]  ;;  %1770 = vmatprep.subr.mxu1 %v1372_v50 }
 0x193   :  { %1331 = vmatpush2.msra.mxu0 %v1252_v54  ;;  %v1371_v54 = vld [vmem:[%s3324_s7 + $0x80] sm:$0xff]  ;;  %1771 = vmatpush3.msra.mxu1 %v1356_v33 }
 0x194   :  { %1332 = vmatprep.subr.mxu0 %v1251_v27  ;;  %v1355_v27 = vld [vmem:[%s3324_s7] sm:$0xff]  ;;  %1772 = vmatprep.subr.mxu1 %v1371_v54 }
 0x195   :  { %1333 = vmatpush2.msra.mxu0 %v1250_v36  ;;  %1773 = vmatpush3.msra.mxu1 %v1355_v27  ;;  %v1272_v36 = vlaneseq }
 0x196   :  { %1334 = vmatprep.subr.mxu0 %v1249_v59 }
 0x197   :  { %1335 = vmatpush2.msra.mxu0 %v1248_v57  ;;  %v1273_v59 = vshrl.u32 %v1272_v36, 7  ;;  %v1465_v11 = vand.u32 127, %v1272_v36 }
 0x198   :  { %1336 = vmatprep.subr.mxu0 %v1247_v13  ;;  %v1270_v13 = vld [vmem:[%s3326_s6] sm:$0x3] }
 0x199   :  { %1337 = vmatpush2.msra.mxu0 %v1246_v49  ;;  %v1274_v57 = vsub.s32 0, %v1273_v59  ;;  %v1278_v49 = vsub.s32 1, %v1273_v59  ;;  %vm1472_vm8 = vcmp.eq.s32.totalorder %v1465_v11, 0 }
 0x19a   :  { %1338 = vmatprep.subr.mxu0 %v1245_v3 }
 0x19b   :  { %1339 = vmatpush2.msra.mxu0 %v1244_v53  ;;  %v1275_v3 = vrot.slane %v1270_v13, %v1274_v57  ;;  %v1279_v53 = vrot.slane %v1270_v13, %v1278_v49 }
 0x19c   :  { %1340 = vmatprep.subr.mxu0 %v1243_v37 }
 0x19d   :  { %1341 = vmatpush2.msra.mxu0 %v1242_v6 }
 0x19e   :  { %1342 = vmatprep.subr.mxu0 %v1241_v51 }
 0x19f   :  { %1343 = vmatpush2.msra.mxu0 %v1240_v41 }
 0x1a0   :  { %1344 = vmatprep.subr.mxu0 %v1239_v43 }
 0x1a1   :  { %1345 = vmatpush2.msra.mxu0 %v1238_v45 }
 0x200   :  { %v1634_v15 = vpop.f32.mrf.mxu0  ;;  %v1669_v22 = vpop.f32.mrf.mxu1 }
 0x202   :  { %v1635_v23 = vpop.f32.mrf.mxu0  ;;  %v1670_v47 = vpop.f32.mrf.mxu1 }
 0x203   :  { %v1636_v55 = vadd.f32 %v1635_v23, %v1634_v15  ;;  %v1671_v8 = vadd.f32 %v1670_v47, %v1669_v22 }
 0x205   :  { %v950_v7 = vadd.f32 %v1636_v55, %v1600_v48 }
 0x207   :  { %v1020_v10 = vadd.f32 %v1671_v8, %v950_v7 }
 0x209   :  { %v1023_v34 = vmax.f32 %v1020_v10, 0.0 }
 0x221   :  { %v1704_v30 = vpop.f32.mrf.mxu0  ;;  %v1739_v31 = vpop.f32.mrf.mxu1 }
 0x223   :  { %v1705_v61 = vpop.f32.mrf.mxu0  ;;  %v1740_v28 = vpop.f32.mrf.mxu1 }
 0x224   :  { %v1706_v19 = vadd.f32 %v1705_v61, %v1704_v30  ;;  %v1741_v29 = vadd.f32 %v1740_v28, %v1739_v31 }
 0x226   :  { %v1132_v18 = vadd.f32 %v1706_v19, %v1600_v48 }
 0x228   :  { %v1202_v14 = vadd.f32 %v1741_v29, %v1132_v18 }
 0x22a   :  { %v1205_v16 = vmax.f32 %v1202_v14, 0.0 }
 0x22c   :  { %1346 = vmatprep.mubr.f32.mxu0 %v1205_v16 }
 0x22d   :  { %1347 = vmatmul.mubr.f32.vlgmr.msra.gmra.mxu0 %v1023_v34 }
 0x2ed   :  { %v1348_v37 = vpop.f32.mrf.mxu0 }
 0x2ee   :  { %v1349_v6 = vadd.f32 %v1348_v37, %v1275_v3 }
 0x2ef   :  { %v1350_v51 = vpop.f32.mrf.mxu0 }
 0x2f0   :  { %v1351_v38 = vadd.f32 %v1350_v51, %v1279_v53  ;;  %v1353_v40 = vmax.f32 %v1349_v6, 0.0 }
 0x2f2   :  { %v1354_v39 = vmax.f32 %v1351_v38, 0.0 }
 0x2f4   :  { %1458 = vmatprep.mubr.f32.mxu1 %v1354_v39 }
 0x2f5   :  { %1459 = vmatmul.mubr.f32.vlgmr.msra.gmra.mxu1 %v1353_v40 }
 0x3b5   :  { %v1774_v41 = vpop.f32.mrf.mxu1 }
 0x3b7   :  { %v1775_v43 = vpop.f32.mrf.mxu1 }
 0x3b8   :  { %v1776_v44 = vadd.f32 %v1775_v43, %v1774_v41 }
 0x3ba   :  { %v1461_v45 = vadd.f32 %v1776_v44, %v1601_v42 }
 0x3bc   :  { %v1466_v46 = vsub.f32 0.0, %v1461_v45 }
 0x3be   :  { %v1467_v24 = vmul.f32 1.442695, %v1466_v46 }
 0x3c0   :  { %1778 = vpow2.f32 %v1467_v24 }
 0x3cd   :  { %v1779_v32 = vpop.eup %1778 }
 0x3ce   :  { %v1469_v17 = vadd.f32 1.0, %v1779_v32 }
 0x3d0   :  { %1780 = vrcp.f32 %v1469_v17 }
 0x3dd   :  { %v1781_v12 = vpop.eup %1780 }
 0x3de   :  { %v1473_v35 = vsel %vm1472_vm8, %v1781_v12, %v1461_v45 }
 0x3df   :  { %1474 = vst [vmem:[%s3328_s9] sm:$0xff] %v1473_v35 }

</bundles_post_ra>
